<compile_context>
chip_gen: v7x
topology: tpu7x:2x2x1
jax: 0.10.0
libtpu: 0.0.40
codegen_flags: <defaults>
</compile_context>

<pallas_src>
import functools

import jax
import jax.numpy as jnp
from jax.experimental import pallas as pl
from jax.experimental.pallas import tpu as pltpu


# ----------------------------- fused Pallas kernel (one grid step = one layer) -----------------------------

def _mrc_kernel(x_ref, mlane_ref, msub_ref, lab_ref,
                eg_ref, eb_ref,
                wqkv_ref, bqkv_ref, wo_ref, bo_ref, g1_ref, b1_ref,
                wi_ref, bi_ref, wout_ref, bout_ref, g2_ref, b2_ref,
                wse_ref, bse_ref,
                out_ref,
                x_scr,
                *, n_heads):
    S, H = x_scr.shape
    dh = H // n_heads
    l = pl.program_id(1)

    def ln(x, g, b):  # f32 LayerNorm
        mu = jnp.mean(x, axis=-1, keepdims=True)
        var = jnp.mean(jnp.square(x - mu), axis=-1, keepdims=True)
        return (x - mu) * jax.lax.rsqrt(var + 1e-12) * g + b

    # ---- first layer step: embedding LayerNorm -> resident bf16 activation ----
    @pl.when(l == 0)
    def _():
        xe = x_ref[...].astype(jnp.float32)
        x_scr[...] = ln(xe, eg_ref[...], eb_ref[...]).astype(jnp.bfloat16)

    # ---- transformer layer l (current weight blocks belong to layer l) ----
    x_bf = x_scr[...]                                # (S, H) bf16
    x_f32 = x_bf.astype(jnp.float32)

    qkv = jnp.dot(x_bf, wqkv_ref[...],
                  preferred_element_type=jnp.float32) + bqkv_ref[...]       # (S, 3H) f32
    # head-major QKV lanes: [Q_h0..Q_h{nh-1} | K ... | V ...]; 1/sqrt(dh) folded into Q weights.
    q = pltpu.einshape("mhd->hmd", qkv[:, 0 * H:1 * H].reshape(S, n_heads, dh)).astype(jnp.bfloat16)
    k = pltpu.einshape("mhd->hmd", qkv[:, 1 * H:2 * H].reshape(S, n_heads, dh)).astype(jnp.bfloat16)
    v = pltpu.einshape("mhd->hmd", qkv[:, 2 * H:3 * H].reshape(S, n_heads, dh)).astype(jnp.bfloat16)

    # additive attention bias from mask.gt(0), broadcast over heads / query rows
    bias = jnp.where(mlane_ref[...] > 0, 0.0, -1e9).astype(jnp.float32)     # (1, S)
    s = jnp.einsum('hid,hjd->hij', q, k,
                   preferred_element_type=jnp.float32) + bias[None]         # (nh, S, S) f32
    m = jnp.max(s, axis=-1, keepdims=True)
    p = jnp.exp(s - m)
    p = p / jnp.sum(p, axis=-1, keepdims=True)                              # exact softmax (f32)
    ctx = jnp.einsum('hij,hjd->hid', p.astype(jnp.bfloat16), v,
                     preferred_element_type=jnp.float32)                    # (nh, S, dh) f32
    ctx = pltpu.einshape("hmd->mhd", ctx).reshape(S, H)

    attn = jnp.dot(ctx.astype(jnp.bfloat16), wo_ref[...],
                   preferred_element_type=jnp.float32) + bo_ref[...]
    x1 = ln(x_f32 + attn, g1_ref[...], b1_ref[...])                         # f32

    ff = jnp.dot(x1.astype(jnp.bfloat16), wi_ref[...],
                 preferred_element_type=jnp.float32) + bi_ref[...]
    # TODO(synk): PyTorch/HF BERT GELU is exact erf; tanh approximation used here (~1e-3 drift).
    ff = jax.nn.gelu(ff, approximate=True)
    ff = jnp.dot(ff.astype(jnp.bfloat16), wout_ref[...],
                 preferred_element_type=jnp.float32) + bout_ref[...]
    x2 = ln(x1 + ff, g2_ref[...], b2_ref[...])
    x_scr[...] = x2.astype(jnp.bfloat16)

    # nn.Dropout(0.5) is identity at inference (eval mode).

    # ---- last layer step: fused start/end heads + CE loss + decode, one lane-dense store ----
    @pl.when(l == pl.num_programs(1) - 1)
    def _():
        xf = x_scr[...]
        # (H, 128) zero-padded head weight: lanes 0,1 = start logits, 2,3 = end logits, rest 0
        se = jnp.dot(xf, wse_ref[...],
                     preferred_element_type=jnp.float32) + bse_ref[...]     # (S, 128) f32
        s0, s1 = se[:, 0:1], se[:, 1:2]
        e0, e1 = se[:, 2:3], se[:, 3:4]

        lab = lab_ref[...]                                                  # (S, 2) int32
        sl, el = lab[:, 0:1], lab[:, 1:2]

        # CrossEntropyLoss(reduction='sum') over this batch's tokens (no ignore_index,
        # matching the PyTorch reference); wrapper sums the per-batch partials.
        def ce_sum(l0, l1, y):
            mx = jnp.maximum(l0, l1)
            lse = mx + jnp.log(jnp.exp(l0 - mx) + jnp.exp(l1 - mx))
            picked = jnp.where(y == 1, l1, l0)
            return jnp.sum(lse - picked)

        loss = ce_sum(s0, s1, sl) + ce_sum(e0, e1, el)

        # decode(): masked_fill(logits[..., 1], mask != 3, finfo.min) then argmax(-1)
        neg = jnp.finfo(jnp.float32).min
        keep = msub_ref[...] == 3                                           # (S, 1)
        spred = (jnp.where(keep, s1, neg) > s0).astype(jnp.float32)         # ties -> index 0
        epred = (jnp.where(keep, e1, neg) > e0).astype(jnp.float32)

        lane = jax.lax.broadcasted_iota(jnp.int32, (S, 128), 1)
        slab = jnp.where(lane == 4, spred, se)
        slab = jnp.where(lane == 5, epred, slab)
        slab = jnp.where(lane == 6, loss, slab)
        out_ref[...] = slab


# ----------------------------- pallas_call wrapper -----------------------------

def fused_mrc_forward(x_emb, mask_lane, mask_sub, labels, packed, *,
                      n_layers, n_heads, batch, seq_len, hidden):
    (eg, eb, wqkv, bqkv, wo, bo, g1, b1,
     wi, bi, wout, bout, g2, b2, wse, bse) = packed

    def batch_spec(shape):   # per-batch blocks, resident across the layer axis
        return pl.BlockSpec((None,) + tuple(shape[1:]),
                            lambda b, l: (b,) + (0,) * (len(shape) - 1))

    def layer_spec(shape):   # per-layer weight blocks, streamed / double-buffered over l
        return pl.BlockSpec((None,) + tuple(shape[1:]),
                            lambda b, l: (l,) + (0,) * (len(shape) - 1))

    def const_spec(shape):   # layer-independent parameters
        return pl.BlockSpec(tuple(shape), lambda b, l, n=len(shape): (0,) * n)

    in_specs = [
        batch_spec(x_emb.shape), batch_spec(mask_lane.shape),
        batch_spec(mask_sub.shape), batch_spec(labels.shape),
        const_spec(eg.shape), const_spec(eb.shape),
        layer_spec(wqkv.shape), layer_spec(bqkv.shape),
        layer_spec(wo.shape), layer_spec(bo.shape),
        layer_spec(g1.shape), layer_spec(b1.shape),
        layer_spec(wi.shape), layer_spec(bi.shape),
        layer_spec(wout.shape), layer_spec(bout.shape),
        layer_spec(g2.shape), layer_spec(b2.shape),
        const_spec(wse.shape), const_spec(bse.shape),
    ]

    kern = functools.partial(_mrc_kernel, n_heads=n_heads)
    return pl.pallas_call(
        kern,
        out_shape=jax.ShapeDtypeStruct((batch, seq_len, 128), jnp.float32),
        grid_spec=pltpu.PrefetchScalarGridSpec(
            num_scalar_prefetch=0,
            grid=(batch, n_layers),
            in_specs=in_specs,
            out_specs=pl.BlockSpec((None, seq_len, 128), lambda b, l: (b, 0, 0)),
            scratch_shapes=[pltpu.VMEM((seq_len, hidden), jnp.bfloat16)],
        ),
        compiler_params=pltpu.CompilerParams(
            dimension_semantics=("parallel", "arbitrary"),
            vmem_limit_bytes=32 * 1024 * 1024,
        ),
    )(x_emb, mask_lane, mask_sub, labels, *packed)


# ----------------------------- parameters -----------------------------

def init_params(key, *, vocab=128, max_pos=64, hidden=32, n_layers=2, n_heads=2, intermediate=64):
    def nrm(k, shape):
        return (jax.random.normal(k, shape, jnp.float32) * 0.02).astype(jnp.float32)

    keys = iter(jax.random.split(key, 8 + 6 * n_layers))
    params = {
        "n_heads": n_heads,
        "word_emb": nrm(next(keys), (vocab, hidden)),
        "pos_emb": nrm(next(keys), (max_pos, hidden)),
        "type_emb": nrm(next(keys), (2, hidden)),
        "emb_ln_g": jnp.ones((hidden,), jnp.float32),
        "emb_ln_b": jnp.zeros((hidden,), jnp.float32),
        "start_w": nrm(next(keys), (hidden, 2)),
        "start_b": jnp.zeros((2,), jnp.float32),
        "end_w": nrm(next(keys), (hidden, 2)),
        "end_b": jnp.zeros((2,), jnp.float32),
        "layers": [],
    }
    for _ in range(n_layers):
        params["layers"].append({
            "w_qkv": nrm(next(keys), (hidden, 3 * hidden)),
            "b_qkv": jnp.zeros((3 * hidden,), jnp.float32),
            "w_o": nrm(next(keys), (hidden, hidden)),
            "b_o": jnp.zeros((hidden,), jnp.float32),
            "ln1_g": jnp.ones((hidden,), jnp.float32),
            "ln1_b": jnp.zeros((hidden,), jnp.float32),
            "w_i": nrm(next(keys), (hidden, intermediate)),
            "b_i": jnp.zeros((intermediate,), jnp.float32),
            "w_out": nrm(next(keys), (intermediate, hidden)),
            "b_out": jnp.zeros((hidden,), jnp.float32),
            "ln2_g": jnp.ones((hidden,), jnp.float32),
            "ln2_b": jnp.zeros((hidden,), jnp.float32),
        })
    return params


def _pack_params(params):
    """Stack per-layer weights on axis 0 (bf16 matmul weights, f32 LN/bias),
    fold 1/sqrt(dh) into Q, fuse + lane-pad the start/end head to (H, 128)."""
    H = params["word_emb"].shape[1]
    NL = len(params["layers"])
    nh = params["n_heads"]
    dh = H // nh
    scale = 1.0 / float(dh) ** 0.5
    bf = jnp.bfloat16

    def stk(name):
        return jnp.stack([lyr[name] for lyr in params["layers"]], axis=0)

    w_qkv = stk("w_qkv")                                  # (NL, H, 3H)
    b_qkv = stk("b_qkv")                                  # (NL, 3H)
    q_scale = jnp.concatenate([jnp.full((H,), scale, jnp.float32),
                               jnp.ones((2 * H,), jnp.float32)])
    w_qkv = w_qkv * q_scale[None, None, :]
    b_qkv = b_qkv * q_scale[None, :]

    w_se = jnp.concatenate([params["start_w"], params["end_w"]], axis=1)   # (H, 4)
    w_se = jnp.pad(w_se, ((0, 0), (0, 124)))                               # (H, 128)
    b_se = jnp.concatenate([params["start_b"], params["end_b"]])           # (4,)
    b_se = jnp.pad(b_se, (0, 124)).reshape(1, 128)

    packed = [
        params["emb_ln_g"].reshape(1, H).astype(jnp.float32),
        params["emb_ln_b"].reshape(1, H).astype(jnp.float32),
        w_qkv.astype(bf),
        b_qkv.reshape(NL, 1, 3 * H).astype(jnp.float32),
        stk("w_o").astype(bf),
        stk("b_o").reshape(NL, 1, H).astype(jnp.float32),
        stk("ln1_g").reshape(NL, 1, H).astype(jnp.float32),
        stk("ln1_b").reshape(NL, 1, H).astype(jnp.float32),
        stk("w_i").astype(bf),
        stk("b_i").reshape(NL, 1, -1).astype(jnp.float32),
        stk("w_out").astype(bf),
        stk("b_out").reshape(NL, 1, H).astype(jnp.float32),
        stk("ln2_g").reshape(NL, 1, H).astype(jnp.float32),
        stk("ln2_b").reshape(NL, 1, H).astype(jnp.float32),
        w_se.astype(bf),
        b_se.astype(jnp.float32),
    ]
    return packed


# ----------------------------- forward -----------------------------

def plm_mrc_forward(params, input_ids, mask, start_labels=None, end_labels=None, decode=True):
    B, S = input_ids.shape
    H = params["word_emb"].shape[1]
    nh = params["n_heads"]
    NL = len(params["layers"])

    # embeddings (gathers are host/JAX glue; everything else runs inside the fused kernel)
    x_emb = (params["word_emb"][input_ids]
             + params["pos_emb"][:S][None, :, :]
             + params["type_emb"][0][None, None, :]).astype(jnp.bfloat16)   # (B, S, H)

    have_labels = start_labels is not None
    sl = start_labels if have_labels else jnp.zeros((B, S), jnp.int32)
    el = end_labels if have_labels else jnp.zeros((B, S), jnp.int32)
    labels = jnp.stack([sl, el], axis=-1).astype(jnp.int32)                 # (B, S, 2)
    mask_lane = mask.reshape(B, 1, S).astype(jnp.int32)                     # key-position layout
    mask_sub = mask.reshape(B, S, 1).astype(jnp.int32)                      # per-token layout

    slab = fused_mrc_forward(x_emb, mask_lane, mask_sub, labels, _pack_params(params),
                             n_layers=NL, n_heads=nh, batch=B, seq_len=S, hidden=H)

    results = {"start_logits": slab[:, :, 0:2], "end_logits": slab[:, :, 2:4]}
    if have_labels:
        results["loss"] = jnp.sum(slab[:, 0, 6])        # sum of per-batch partial CE losses
    if decode:
        results["start_pred"] = slab[:, :, 4].astype(jnp.int32)
        results["end_pred"] = slab[:, :, 5].astype(jnp.int32)
    return results


# ----------------------------- host-side decode (Python glue) -----------------------------

def extract_positions_from_start_end_label(start_idxes, end_idxes):
    positions = []
    ends = [i for i, v in enumerate(end_idxes) if v == 1]
    for s, v in enumerate(start_idxes):
        if v != 1:
            continue
        cands = [e for e in ends if e >= s]
        if cands:
            positions.append((s, cands[0]))
    return positions


def decode_batch(start_pred, end_pred, raw_tokens, ent_type, ent_offset):
    # TODO(synk): span->string assembly over raw_tokens/ent_type/ent_offset is host-side
    # Python over ragged data; no Pallas equivalent (kernel supplies start_pred/end_pred).
    batch_preds = []
    for s_idx, e_idx, toks, etype, off in zip(start_pred, end_pred, raw_tokens, ent_type, ent_offset):
        pred_ents = []
        for s, e in extract_positions_from_start_end_label(list(s_idx), list(e_idx)):
            new_s, new_e = s - off, e - off + 1
            pred_ents.append(("".join(toks[new_s:new_e]), etype, (new_s, new_e)))
        batch_preds.append(pred_ents)
    return batch_preds


# ----------------------------- main -----------------------------

if __name__ == "__main__":
    B, S, H, NH, NL, INTER, VOCAB = 2, 8, 32, 2, 2, 64, 128

    key = jax.random.PRNGKey(0)
    k_par, k_ids, k_sl, k_el = jax.random.split(key, 4)

    params = init_params(k_par, vocab=VOCAB, max_pos=64, hidden=H,
                         n_layers=NL, n_heads=NH, intermediate=INTER)

    input_ids = jax.random.randint(k_ids, (B, S), 0, VOCAB, dtype=jnp.int32)
    # mask convention: 0 = pad, 1 = special token, 3 = context token eligible for prediction
    mask = jnp.array([[1, 3, 3, 3, 3, 1, 0, 0],
                      [1, 3, 3, 3, 1, 0, 0, 0]], dtype=jnp.int32)
    start_labels = jax.random.randint(k_sl, (B, S), 0, 2, dtype=jnp.int32)
    end_labels = jax.random.randint(k_el, (B, S), 0, 2, dtype=jnp.int32)

    results = plm_mrc_forward(params, input_ids, mask, start_labels, end_labels, decode=True)
    jax.block_until_ready((results["start_logits"], results["end_logits"], results["loss"],
                           results["start_pred"], results["end_pred"]))

    raw_tokens = [[chr(ord("a") + t) for t in range(S)] for _ in range(B)]
    ent_type = ["PER", "LOC"]
    ent_offset = [0, 0]
    results["pred"] = decode_batch(jax.device_get(results["start_pred"]),
                                   jax.device_get(results["end_pred"]),
                                   raw_tokens, ent_type, ent_offset)

    print("KERNEL_OK")
</pallas_src>

<mosaic_0001>
module attributes {stable_mosaic.version = 11 : i64} {
  func.func @_mrc_kernel(%arg0: i32, %arg1: i32, %arg2: memref<1x8x32xbf16, #tpu.memory_space<vmem>>, %arg3: memref<1x1x8xi32, #tpu.memory_space<vmem>>, %arg4: memref<1x8x1xi32, #tpu.memory_space<vmem>>, %arg5: memref<1x8x2xi32, #tpu.memory_space<vmem>>, %arg6: memref<1x32xf32, #tpu.memory_space<vmem>>, %arg7: memref<1x32xf32, #tpu.memory_space<vmem>>, %arg8: memref<1x32x96xbf16, #tpu.memory_space<vmem>>, %arg9: memref<1x1x96xf32, #tpu.memory_space<vmem>>, %arg10: memref<1x32x32xbf16, #tpu.memory_space<vmem>>, %arg11: memref<1x1x32xf32, #tpu.memory_space<vmem>>, %arg12: memref<1x1x32xf32, #tpu.memory_space<vmem>>, %arg13: memref<1x1x32xf32, #tpu.memory_space<vmem>>, %arg14: memref<1x32x64xbf16, #tpu.memory_space<vmem>>, %arg15: memref<1x1x64xf32, #tpu.memory_space<vmem>>, %arg16: memref<1x64x32xbf16, #tpu.memory_space<vmem>>, %arg17: memref<1x1x32xf32, #tpu.memory_space<vmem>>, %arg18: memref<1x1x32xf32, #tpu.memory_space<vmem>>, %arg19: memref<1x1x32xf32, #tpu.memory_space<vmem>>, %arg20: memref<32x128xbf16, #tpu.memory_space<vmem>>, %arg21: memref<1x128xf32, #tpu.memory_space<vmem>>, %arg22: memref<1x8x128xf32, #tpu.memory_space<vmem>>, %arg23: memref<8x32xbf16, #tpu.memory_space<vmem>>) attributes {dimension_semantics = [#tpu.dimension_semantics<parallel>, #tpu.dimension_semantics<arbitrary>], iteration_bounds = array<i64: 2, 2>, scalar_prefetch = 0 : i64, scratch_operands = 1 : i64, tpu.core_type = #tpu.core_type<tc>, window_params = [{transform_indices = @transform_0, window_bounds = array<i64: 1, 8, 32>}, {transform_indices = @transform_1, window_bounds = array<i64: 1, 1, 8>}, {transform_indices = @transform_2, window_bounds = array<i64: 1, 8, 1>}, {transform_indices = @transform_3, window_bounds = array<i64: 1, 8, 2>}, {pipeline_mode = #tpu.pipeline_mode<synchronous>, transform_indices = @transform_4, window_bounds = array<i64: 1, 32>}, {pipeline_mode = #tpu.pipeline_mode<synchronous>, transform_indices = @transform_5, window_bounds = array<i64: 1, 32>}, {transform_indices = @transform_6, window_bounds = array<i64: 1, 32, 96>}, {transform_indices = @transform_7, window_bounds = array<i64: 1, 1, 96>}, {transform_indices = @transform_8, window_bounds = array<i64: 1, 32, 32>}, {transform_indices = @transform_9, window_bounds = array<i64: 1, 1, 32>}, {transform_indices = @transform_10, window_bounds = array<i64: 1, 1, 32>}, {transform_indices = @transform_11, window_bounds = array<i64: 1, 1, 32>}, {transform_indices = @transform_12, window_bounds = array<i64: 1, 32, 64>}, {transform_indices = @transform_13, window_bounds = array<i64: 1, 1, 64>}, {transform_indices = @transform_14, window_bounds = array<i64: 1, 64, 32>}, {transform_indices = @transform_15, window_bounds = array<i64: 1, 1, 32>}, {transform_indices = @transform_16, window_bounds = array<i64: 1, 1, 32>}, {transform_indices = @transform_17, window_bounds = array<i64: 1, 1, 32>}, {pipeline_mode = #tpu.pipeline_mode<synchronous>, transform_indices = @transform_18, window_bounds = array<i64: 32, 128>}, {pipeline_mode = #tpu.pipeline_mode<synchronous>, transform_indices = @transform_19, window_bounds = array<i64: 1, 128>}, {transform_indices = @transform_20, window_bounds = array<i64: 1, 8, 128>}]} {
    %c0_i32 = arith.constant 0 : i32
    %0 = arith.cmpi eq, %arg1, %c0_i32 : i32
    %1 = arith.extui %0 : i1 to i32
    %c0_i32_0 = arith.constant 0 : i32
    %2 = arith.cmpi ne, %1, %c0_i32_0 : i32
    scf.if %2 {
      %c0_68 = arith.constant 0 : index
      %c0_69 = arith.constant 0 : index
      %c0_70 = arith.constant 0 : index
      %144 = vector.load %arg2[%c0_68, %c0_69, %c0_70] : memref<1x8x32xbf16, #tpu.memory_space<vmem>>, vector<1x8x32xbf16>
      %145 = vector.shape_cast %144 : vector<1x8x32xbf16> to vector<8x32xbf16>
      %146 = arith.extf %145 : vector<8x32xbf16> to vector<8x32xf32>
      %c0_71 = arith.constant 0 : index
      %c0_72 = arith.constant 0 : index
      %147 = vector.load %arg6[%c0_71, %c0_72] : memref<1x32xf32, #tpu.memory_space<vmem>>, vector<1x32xf32>
      %c0_73 = arith.constant 0 : index
      %c0_74 = arith.constant 0 : index
      %148 = vector.load %arg7[%c0_73, %c0_74] : memref<1x32xf32, #tpu.memory_space<vmem>>, vector<1x32xf32>
      %cst_75 = arith.constant dense<0.000000e+00> : vector<8xf32>
      %149 = vector.multi_reduction <add>, %146, %cst_75 [1] : vector<8x32xf32> to vector<8xf32>
      %150 = vector.shape_cast %149 : vector<8xf32> to vector<8x1xf32>
      %cst_76 = arith.constant 3.200000e+01 : f32
      %151 = vector.broadcast %cst_76 : f32 to vector<8x1xf32>
      %152 = arith.divf %150, %151 : vector<8x1xf32>
      %153 = vector.broadcast %152 : vector<8x1xf32> to vector<8x32xf32>
      %154 = arith.subf %146, %153 : vector<8x32xf32>
      %155 = arith.mulf %154, %154 : vector<8x32xf32>
      %cst_77 = arith.constant dense<0.000000e+00> : vector<8xf32>
      %156 = vector.multi_reduction <add>, %155, %cst_77 [1] : vector<8x32xf32> to vector<8xf32>
      %157 = vector.shape_cast %156 : vector<8xf32> to vector<8x1xf32>
      %cst_78 = arith.constant 3.200000e+01 : f32
      %158 = vector.broadcast %cst_78 : f32 to vector<8x1xf32>
      %159 = arith.divf %157, %158 : vector<8x1xf32>
      %160 = vector.broadcast %152 : vector<8x1xf32> to vector<8x32xf32>
      %161 = arith.subf %146, %160 : vector<8x32xf32>
      %cst_79 = arith.constant 9.99999996E-13 : f32
      %162 = vector.broadcast %cst_79 : f32 to vector<8x1xf32>
      %163 = arith.addf %159, %162 : vector<8x1xf32>
      %164 = math.rsqrt %163 : vector<8x1xf32>
      %165 = vector.broadcast %164 : vector<8x1xf32> to vector<8x32xf32>
      %166 = arith.mulf %161, %165 : vector<8x32xf32>
      %167 = vector.broadcast %147 : vector<1x32xf32> to vector<8x32xf32>
      %168 = arith.mulf %166, %167 : vector<8x32xf32>
      %169 = vector.broadcast %148 : vector<1x32xf32> to vector<8x32xf32>
      %170 = arith.addf %168, %169 : vector<8x32xf32>
      %171 = arith.truncf %170 : vector<8x32xf32> to vector<8x32xbf16>
      %c0_80 = arith.constant 0 : index
      %c0_81 = arith.constant 0 : index
      %172 = vector.load %arg23[%c0_80, %c0_81] : memref<8x32xbf16, #tpu.memory_space<vmem>>, vector<8x32xbf16>
      tpu.vector_store %arg23[%c0_80, %c0_81], %171 {strides = array<i32>} : memref<8x32xbf16, #tpu.memory_space<vmem>>, vector<8x32xbf16>,
    } else {
    }
    %c0 = arith.constant 0 : index
    %c0_1 = arith.constant 0 : index
    %3 = vector.load %arg23[%c0, %c0_1] : memref<8x32xbf16, #tpu.memory_space<vmem>>, vector<8x32xbf16>
    %4 = arith.extf %3 : vector<8x32xbf16> to vector<8x32xf32>
    %c0_2 = arith.constant 0 : index
    %c0_3 = arith.constant 0 : index
    %c0_4 = arith.constant 0 : index
    %5 = vector.load %arg8[%c0_2, %c0_3, %c0_4] : memref<1x32x96xbf16, #tpu.memory_space<vmem>>, vector<1x32x96xbf16>
    %6 = vector.shape_cast %5 : vector<1x32x96xbf16> to vector<32x96xbf16>
    %cst = arith.constant dense<0.000000e+00> : vector<8x96xf32>
    %7 = tpu.matmul %3, %6, %cst {dimension_numbers = #tpu.dot_dimension_numbers<[1], [0], [0], [1], [0, 0, 1, 1], [], []>} : vector<8x32xbf16>, vector<32x96xbf16>, vector<8x96xf32> -> vector<8x96xf32>
    %c0_5 = arith.constant 0 : index
    %c0_6 = arith.constant 0 : index
    %c0_7 = arith.constant 0 : index
    %8 = vector.load %arg9[%c0_5, %c0_6, %c0_7] : memref<1x1x96xf32, #tpu.memory_space<vmem>>, vector<1x1x96xf32>
    %9 = vector.shape_cast %8 : vector<1x1x96xf32> to vector<1x96xf32>
    %10 = vector.broadcast %9 : vector<1x96xf32> to vector<8x96xf32>
    %11 = arith.addf %7, %10 : vector<8x96xf32>
    %12 = vector.extract_strided_slice %11 {offsets = [0, 0], sizes = [8, 32], strides = [1, 1]} : vector<8x96xf32> to vector<8x32xf32>
    %13 = vector.shape_cast %12 : vector<8x32xf32> to vector<8x2x16xf32>
    %14 = tpu.transpose %13, [1, 0, 2] : vector<8x2x16xf32> -> vector<2x8x16xf32>
    %15 = arith.truncf %14 : vector<2x8x16xf32> to vector<2x8x16xbf16>
    %16 = vector.extract_strided_slice %11 {offsets = [0, 32], sizes = [8, 32], strides = [1, 1]} : vector<8x96xf32> to vector<8x32xf32>
    %17 = vector.shape_cast %16 : vector<8x32xf32> to vector<8x2x16xf32>
    %18 = tpu.transpose %17, [1, 0, 2] : vector<8x2x16xf32> -> vector<2x8x16xf32>
    %19 = arith.truncf %18 : vector<2x8x16xf32> to vector<2x8x16xbf16>
    %20 = vector.extract_strided_slice %11 {offsets = [0, 64], sizes = [8, 32], strides = [1, 1]} : vector<8x96xf32> to vector<8x32xf32>
    %21 = vector.shape_cast %20 : vector<8x32xf32> to vector<8x2x16xf32>
    %22 = tpu.transpose %21, [1, 0, 2] : vector<8x2x16xf32> -> vector<2x8x16xf32>
    %23 = arith.truncf %22 : vector<2x8x16xf32> to vector<2x8x16xbf16>
    %c0_8 = arith.constant 0 : index
    %c0_9 = arith.constant 0 : index
    %c0_10 = arith.constant 0 : index
    %24 = vector.load %arg3[%c0_8, %c0_9, %c0_10] : memref<1x1x8xi32, #tpu.memory_space<vmem>>, vector<1x1x8xi32>
    %25 = vector.shape_cast %24 : vector<1x1x8xi32> to vector<1x8xi32>
    %c0_i32_11 = arith.constant 0 : i32
    %26 = vector.broadcast %c0_i32_11 : i32 to vector<1x8xi32>
    %27 = arith.cmpi sgt, %25, %26 : vector<1x8xi32>
    %cst_12 = arith.constant 0.000000e+00 : f32
    %cst_13 = arith.constant -1.000000e+09 : f32
    %28 = vector.broadcast %cst_12 : f32 to vector<1x8xf32>
    %29 = vector.broadcast %cst_13 : f32 to vector<1x8xf32>
    %30 = arith.select %27, %28, %29 : vector<1x8xi1>, vector<1x8xf32>
    "tpu.trace_start"() <{level = 10 : i32, message = "hid,hjd->hij"}> : () -> ()
    %cst_14 = arith.constant dense<0.000000e+00> : vector<2x8x8xf32>
    %31 = tpu.matmul %15, %19, %cst_14 {dimension_numbers = #tpu.dot_dimension_numbers<[2], [2], [1], [1], [0, 0, 0, 1, 1, 1], [0], [0]>} : vector<2x8x16xbf16>, vector<2x8x16xbf16>, vector<2x8x8xf32> -> vector<2x8x8xf32>
    "tpu.trace_stop"() : () -> ()
    %32 = vector.shape_cast %30 : vector<1x8xf32> to vector<1x1x8xf32>
    %33 = vector.broadcast %32 : vector<1x1x8xf32> to vector<2x8x8xf32>
    %34 = arith.addf %31, %33 : vector<2x8x8xf32>
    %cst_15 = arith.constant dense<0xFF800000> : vector<2x8xf32>
    %35 = vector.multi_reduction <maximumf>, %34, %cst_15 [2] : vector<2x8x8xf32> to vector<2x8xf32>
    %36 = vector.shape_cast %35 : vector<2x8xf32> to vector<2x8x1xf32>
    %37 = vector.broadcast %36 : vector<2x8x1xf32> to vector<2x8x8xf32>
    %38 = arith.subf %34, %37 : vector<2x8x8xf32>
    %39 = math.exp %38 : vector<2x8x8xf32>
    %cst_16 = arith.constant dense<0.000000e+00> : vector<2x8xf32>
    %40 = vector.multi_reduction <add>, %39, %cst_16 [2] : vector<2x8x8xf32> to vector<2x8xf32>
    %41 = vector.shape_cast %40 : vector<2x8xf32> to vector<2x8x1xf32>
    %42 = vector.broadcast %41 : vector<2x8x1xf32> to vector<2x8x8xf32>
    %43 = arith.divf %39, %42 : vector<2x8x8xf32>
    %44 = arith.truncf %43 : vector<2x8x8xf32> to vector<2x8x8xbf16>
    "tpu.trace_start"() <{level = 10 : i32, message = "hij,hjd->hid"}> : () -> ()
    %cst_17 = arith.constant dense<0.000000e+00> : vector<2x8x16xf32>
    %45 = tpu.matmul %44, %23, %cst_17 {dimension_numbers = #tpu.dot_dimension_numbers<[2], [1], [1], [2], [0, 0, 0, 1, 1, 2], [0], [0]>} : vector<2x8x8xbf16>, vector<2x8x16xbf16>, vector<2x8x16xf32> -> vector<2x8x16xf32>
    "tpu.trace_stop"() : () -> ()
    %46 = tpu.transpose %45, [1, 0, 2] : vector<2x8x16xf32> -> vector<8x2x16xf32>
    %47 = vector.shape_cast %46 : vector<8x2x16xf32> to vector<8x32xf32>
    %48 = arith.truncf %47 : vector<8x32xf32> to vector<8x32xbf16>
    %c0_18 = arith.constant 0 : index
    %c0_19 = arith.constant 0 : index
    %c0_20 = arith.constant 0 : index
    %49 = vector.load %arg10[%c0_18, %c0_19, %c0_20] : memref<1x32x32xbf16, #tpu.memory_space<vmem>>, vector<1x32x32xbf16>
    %50 = vector.shape_cast %49 : vector<1x32x32xbf16> to vector<32x32xbf16>
    %cst_21 = arith.constant dense<0.000000e+00> : vector<8x32xf32>
    %51 = tpu.matmul %48, %50, %cst_21 {dimension_numbers = #tpu.dot_dimension_numbers<[1], [0], [0], [1], [0, 0, 1, 1], [], []>} : vector<8x32xbf16>, vector<32x32xbf16>, vector<8x32xf32> -> vector<8x32xf32>
    %c0_22 = arith.constant 0 : index
    %c0_23 = arith.constant 0 : index
    %c0_24 = arith.constant 0 : index
    %52 = vector.load %arg11[%c0_22, %c0_23, %c0_24] : memref<1x1x32xf32, #tpu.memory_space<vmem>>, vector<1x1x32xf32>
    %53 = vector.shape_cast %52 : vector<1x1x32xf32> to vector<1x32xf32>
    %54 = vector.broadcast %53 : vector<1x32xf32> to vector<8x32xf32>
    %55 = arith.addf %51, %54 : vector<8x32xf32>
    %56 = arith.addf %4, %55 : vector<8x32xf32>
    %c0_25 = arith.constant 0 : index
    %c0_26 = arith.constant 0 : index
    %c0_27 = arith.constant 0 : index
    %57 = vector.load %arg12[%c0_25, %c0_26, %c0_27] : memref<1x1x32xf32, #tpu.memory_space<vmem>>, vector<1x1x32xf32>
    %58 = vector.shape_cast %57 : vector<1x1x32xf32> to vector<1x32xf32>
    %c0_28 = arith.constant 0 : index
    %c0_29 = arith.constant 0 : index
    %c0_30 = arith.constant 0 : index
    %59 = vector.load %arg13[%c0_28, %c0_29, %c0_30] : memref<1x1x32xf32, #tpu.memory_space<vmem>>, vector<1x1x32xf32>
    %60 = vector.shape_cast %59 : vector<1x1x32xf32> to vector<1x32xf32>
    %cst_31 = arith.constant dense<0.000000e+00> : vector<8xf32>
    %61 = vector.multi_reduction <add>, %56, %cst_31 [1] : vector<8x32xf32> to vector<8xf32>
    %62 = vector.shape_cast %61 : vector<8xf32> to vector<8x1xf32>
    %cst_32 = arith.constant 3.200000e+01 : f32
    %63 = vector.broadcast %cst_32 : f32 to vector<8x1xf32>
    %64 = arith.divf %62, %63 : vector<8x1xf32>
    %65 = vector.broadcast %64 : vector<8x1xf32> to vector<8x32xf32>
    %66 = arith.subf %56, %65 : vector<8x32xf32>
    %67 = arith.mulf %66, %66 : vector<8x32xf32>
    %cst_33 = arith.constant dense<0.000000e+00> : vector<8xf32>
    %68 = vector.multi_reduction <add>, %67, %cst_33 [1] : vector<8x32xf32> to vector<8xf32>
    %69 = vector.shape_cast %68 : vector<8xf32> to vector<8x1xf32>
    %cst_34 = arith.constant 3.200000e+01 : f32
    %70 = vector.broadcast %cst_34 : f32 to vector<8x1xf32>
    %71 = arith.divf %69, %70 : vector<8x1xf32>
    %72 = vector.broadcast %64 : vector<8x1xf32> to vector<8x32xf32>
    %73 = arith.subf %56, %72 : vector<8x32xf32>
    %cst_35 = arith.constant 9.99999996E-13 : f32
    %74 = vector.broadcast %cst_35 : f32 to vector<8x1xf32>
    %75 = arith.addf %71, %74 : vector<8x1xf32>
    %76 = math.rsqrt %75 : vector<8x1xf32>
    %77 = vector.broadcast %76 : vector<8x1xf32> to vector<8x32xf32>
    %78 = arith.mulf %73, %77 : vector<8x32xf32>
    %79 = vector.broadcast %58 : vector<1x32xf32> to vector<8x32xf32>
    %80 = arith.mulf %78, %79 : vector<8x32xf32>
    %81 = vector.broadcast %60 : vector<1x32xf32> to vector<8x32xf32>
    %82 = arith.addf %80, %81 : vector<8x32xf32>
    %83 = arith.truncf %82 : vector<8x32xf32> to vector<8x32xbf16>
    %c0_36 = arith.constant 0 : index
    %c0_37 = arith.constant 0 : index
    %c0_38 = arith.constant 0 : index
    %84 = vector.load %arg14[%c0_36, %c0_37, %c0_38] : memref<1x32x64xbf16, #tpu.memory_space<vmem>>, vector<1x32x64xbf16>
    %85 = vector.shape_cast %84 : vector<1x32x64xbf16> to vector<32x64xbf16>
    %cst_39 = arith.constant dense<0.000000e+00> : vector<8x64xf32>
    %86 = tpu.matmul %83, %85, %cst_39 {dimension_numbers = #tpu.dot_dimension_numbers<[1], [0], [0], [1], [0, 0, 1, 1], [], []>} : vector<8x32xbf16>, vector<32x64xbf16>, vector<8x64xf32> -> vector<8x64xf32>
    %c0_40 = arith.constant 0 : index
    %c0_41 = arith.constant 0 : index
    %c0_42 = arith.constant 0 : index
    %87 = vector.load %arg15[%c0_40, %c0_41, %c0_42] : memref<1x1x64xf32, #tpu.memory_space<vmem>>, vector<1x1x64xf32>
    %88 = vector.shape_cast %87 : vector<1x1x64xf32> to vector<1x64xf32>
    %89 = vector.broadcast %88 : vector<1x64xf32> to vector<8x64xf32>
    %90 = arith.addf %86, %89 : vector<8x64xf32>
    %91 = arith.mulf %90, %90 : vector<8x64xf32>
    %92 = arith.mulf %90, %91 : vector<8x64xf32>
    %cst_43 = arith.constant 4.471500e-02 : f32
    %93 = vector.broadcast %cst_43 : f32 to vector<8x64xf32>
    %94 = arith.mulf %93, %92 : vector<8x64xf32>
    %95 = arith.addf %90, %94 : vector<8x64xf32>
    %cst_44 = arith.constant 0.797884583 : f32
    %96 = vector.broadcast %cst_44 : f32 to vector<8x64xf32>
    %97 = arith.mulf %96, %95 : vector<8x64xf32>
    %98 = math.tanh %97 : vector<8x64xf32>
    %cst_45 = arith.constant 1.000000e+00 : f32
    %99 = vector.broadcast %cst_45 : f32 to vector<8x64xf32>
    %100 = arith.addf %99, %98 : vector<8x64xf32>
    %cst_46 = arith.constant 5.000000e-01 : f32
    %101 = vector.broadcast %cst_46 : f32 to vector<8x64xf32>
    %102 = arith.mulf %101, %100 : vector<8x64xf32>
    %103 = arith.mulf %90, %102 : vector<8x64xf32>
    %104 = arith.truncf %103 : vector<8x64xf32> to vector<8x64xbf16>
    %c0_47 = arith.constant 0 : index
    %c0_48 = arith.constant 0 : index
    %c0_49 = arith.constant 0 : index
    %105 = vector.load %arg16[%c0_47, %c0_48, %c0_49] : memref<1x64x32xbf16, #tpu.memory_space<vmem>>, vector<1x64x32xbf16>
    %106 = vector.shape_cast %105 : vector<1x64x32xbf16> to vector<64x32xbf16>
    %cst_50 = arith.constant dense<0.000000e+00> : vector<8x32xf32>
    %107 = tpu.matmul %104, %106, %cst_50 {dimension_numbers = #tpu.dot_dimension_numbers<[1], [0], [0], [1], [0, 0, 1, 1], [], []>} : vector<8x64xbf16>, vector<64x32xbf16>, vector<8x32xf32> -> vector<8x32xf32>
    %c0_51 = arith.constant 0 : index
    %c0_52 = arith.constant 0 : index
    %c0_53 = arith.constant 0 : index
    %108 = vector.load %arg17[%c0_51, %c0_52, %c0_53] : memref<1x1x32xf32, #tpu.memory_space<vmem>>, vector<1x1x32xf32>
    %109 = vector.shape_cast %108 : vector<1x1x32xf32> to vector<1x32xf32>
    %110 = vector.broadcast %109 : vector<1x32xf32> to vector<8x32xf32>
    %111 = arith.addf %107, %110 : vector<8x32xf32>
    %112 = arith.addf %82, %111 : vector<8x32xf32>
    %c0_54 = arith.constant 0 : index
    %c0_55 = arith.constant 0 : index
    %c0_56 = arith.constant 0 : index
    %113 = vector.load %arg18[%c0_54, %c0_55, %c0_56] : memref<1x1x32xf32, #tpu.memory_space<vmem>>, vector<1x1x32xf32>
    %114 = vector.shape_cast %113 : vector<1x1x32xf32> to vector<1x32xf32>
    %c0_57 = arith.constant 0 : index
    %c0_58 = arith.constant 0 : index
    %c0_59 = arith.constant 0 : index
    %115 = vector.load %arg19[%c0_57, %c0_58, %c0_59] : memref<1x1x32xf32, #tpu.memory_space<vmem>>, vector<1x1x32xf32>
    %116 = vector.shape_cast %115 : vector<1x1x32xf32> to vector<1x32xf32>
    %cst_60 = arith.constant dense<0.000000e+00> : vector<8xf32>
    %117 = vector.multi_reduction <add>, %112, %cst_60 [1] : vector<8x32xf32> to vector<8xf32>
    %118 = vector.shape_cast %117 : vector<8xf32> to vector<8x1xf32>
    %cst_61 = arith.constant 3.200000e+01 : f32
    %119 = vector.broadcast %cst_61 : f32 to vector<8x1xf32>
    %120 = arith.divf %118, %119 : vector<8x1xf32>
    %121 = vector.broadcast %120 : vector<8x1xf32> to vector<8x32xf32>
    %122 = arith.subf %112, %121 : vector<8x32xf32>
    %123 = arith.mulf %122, %122 : vector<8x32xf32>
    %cst_62 = arith.constant dense<0.000000e+00> : vector<8xf32>
    %124 = vector.multi_reduction <add>, %123, %cst_62 [1] : vector<8x32xf32> to vector<8xf32>
    %125 = vector.shape_cast %124 : vector<8xf32> to vector<8x1xf32>
    %cst_63 = arith.constant 3.200000e+01 : f32
    %126 = vector.broadcast %cst_63 : f32 to vector<8x1xf32>
    %127 = arith.divf %125, %126 : vector<8x1xf32>
    %128 = vector.broadcast %120 : vector<8x1xf32> to vector<8x32xf32>
    %129 = arith.subf %112, %128 : vector<8x32xf32>
    %cst_64 = arith.constant 9.99999996E-13 : f32
    %130 = vector.broadcast %cst_64 : f32 to vector<8x1xf32>
    %131 = arith.addf %127, %130 : vector<8x1xf32>
    %132 = math.rsqrt %131 : vector<8x1xf32>
    %133 = vector.broadcast %132 : vector<8x1xf32> to vector<8x32xf32>
    %134 = arith.mulf %129, %133 : vector<8x32xf32>
    %135 = vector.broadcast %114 : vector<1x32xf32> to vector<8x32xf32>
    %136 = arith.mulf %134, %135 : vector<8x32xf32>
    %137 = vector.broadcast %116 : vector<1x32xf32> to vector<8x32xf32>
    %138 = arith.addf %136, %137 : vector<8x32xf32>
    %139 = arith.truncf %138 : vector<8x32xf32> to vector<8x32xbf16>
    %c0_65 = arith.constant 0 : index
    %c0_66 = arith.constant 0 : index
    %140 = vector.load %arg23[%c0_65, %c0_66] : memref<8x32xbf16, #tpu.memory_space<vmem>>, vector<8x32xbf16>
    tpu.vector_store %arg23[%c0_65, %c0_66], %139 {strides = array<i32>} : memref<8x32xbf16, #tpu.memory_space<vmem>>, vector<8x32xbf16>,
    %c1_i32 = arith.constant 1 : i32
    %141 = arith.cmpi eq, %arg1, %c1_i32 : i32
    %142 = arith.extui %141 : i1 to i32
    %c0_i32_67 = arith.constant 0 : i32
    %143 = arith.cmpi ne, %142, %c0_i32_67 : i32
    scf.if %143 {
      %c0_68 = arith.constant 0 : index
      %c0_69 = arith.constant 0 : index
      %144 = vector.load %arg23[%c0_68, %c0_69] : memref<8x32xbf16, #tpu.memory_space<vmem>>, vector<8x32xbf16>
      %c0_70 = arith.constant 0 : index
      %c0_71 = arith.constant 0 : index
      %145 = vector.load %arg20[%c0_70, %c0_71] : memref<32x128xbf16, #tpu.memory_space<vmem>>, vector<32x128xbf16>
      %cst_72 = arith.constant dense<0.000000e+00> : vector<8x128xf32>
      %146 = tpu.matmul %144, %145, %cst_72 {dimension_numbers = #tpu.dot_dimension_numbers<[1], [0], [0], [1], [0, 0, 1, 1], [], []>} : vector<8x32xbf16>, vector<32x128xbf16>, vector<8x128xf32> -> vector<8x128xf32>
      %c0_73 = arith.constant 0 : index
      %c0_74 = arith.constant 0 : index
      %147 = vector.load %arg21[%c0_73, %c0_74] : memref<1x128xf32, #tpu.memory_space<vmem>>, vector<1x128xf32>
      %148 = vector.broadcast %147 : vector<1x128xf32> to vector<8x128xf32>
      %149 = arith.addf %146, %148 : vector<8x128xf32>
      %150 = vector.extract_strided_slice %149 {offsets = [0, 0], sizes = [8, 1], strides = [1, 1]} : vector<8x128xf32> to vector<8x1xf32>
      %151 = vector.extract_strided_slice %149 {offsets = [0, 1], sizes = [8, 1], strides = [1, 1]} : vector<8x128xf32> to vector<8x1xf32>
      %152 = vector.extract_strided_slice %149 {offsets = [0, 2], sizes = [8, 1], strides = [1, 1]} : vector<8x128xf32> to vector<8x1xf32>
      %153 = vector.extract_strided_slice %149 {offsets = [0, 3], sizes = [8, 1], strides = [1, 1]} : vector<8x128xf32> to vector<8x1xf32>
      %c0_75 = arith.constant 0 : index
      %c0_76 = arith.constant 0 : index
      %c0_77 = arith.constant 0 : index
      %154 = vector.load %arg5[%c0_75, %c0_76, %c0_77] : memref<1x8x2xi32, #tpu.memory_space<vmem>>, vector<1x8x2xi32>
      %155 = vector.shape_cast %154 : vector<1x8x2xi32> to vector<8x2xi32>
      %156 = vector.extract_strided_slice %155 {offsets = [0, 0], sizes = [8, 1], strides = [1, 1]} : vector<8x2xi32> to vector<8x1xi32>
      %157 = vector.extract_strided_slice %155 {offsets = [0, 1], sizes = [8, 1], strides = [1, 1]} : vector<8x2xi32> to vector<8x1xi32>
      %158 = arith.maximumf %150, %151 : vector<8x1xf32>
      %159 = arith.subf %150, %158 : vector<8x1xf32>
      %160 = math.exp %159 : vector<8x1xf32>
      %161 = arith.subf %151, %158 : vector<8x1xf32>
      %162 = math.exp %161 : vector<8x1xf32>
      %163 = arith.addf %160, %162 : vector<8x1xf32>
      %164 = math.log %163 : vector<8x1xf32>
      %165 = arith.addf %158, %164 : vector<8x1xf32>
      %c1_i32_78 = arith.constant 1 : i32
      %166 = vector.broadcast %c1_i32_78 : i32 to vector<8x1xi32>
      %167 = arith.cmpi eq, %156, %166 : vector<8x1xi32>
      %168 = arith.select %167, %151, %150 : vector<8x1xi1>, vector<8x1xf32>
      %169 = arith.subf %165, %168 : vector<8x1xf32>
      %170 = vector.shape_cast %169 : vector<8x1xf32> to vector<1x8x1xf32>
      %cst_79 = arith.constant dense<0.000000e+00> : vector<1xf32>
      %171 = vector.multi_reduction <add>, %170, %cst_79 [1, 2] : vector<1x8x1xf32> to vector<1xf32>
      %172 = vector.shape_cast %171 : vector<1xf32> to vector<1x1x1xf32>
      %173 = vector.extract %172[0, 0, 0] : f32 from vector<1x1x1xf32>
      %174 = arith.maximumf %152, %153 : vector<8x1xf32>
      %175 = arith.subf %152, %174 : vector<8x1xf32>
      %176 = math.exp %175 : vector<8x1xf32>
      %177 = arith.subf %153, %174 : vector<8x1xf32>
      %178 = math.exp %177 : vector<8x1xf32>
      %179 = arith.addf %176, %178 : vector<8x1xf32>
      %180 = math.log %179 : vector<8x1xf32>
      %181 = arith.addf %174, %180 : vector<8x1xf32>
      %c1_i32_80 = arith.constant 1 : i32
      %182 = vector.broadcast %c1_i32_80 : i32 to vector<8x1xi32>
      %183 = arith.cmpi eq, %157, %182 : vector<8x1xi32>
      %184 = arith.select %183, %153, %152 : vector<8x1xi1>, vector<8x1xf32>
      %185 = arith.subf %181, %184 : vector<8x1xf32>
      %186 = vector.shape_cast %185 : vector<8x1xf32> to vector<1x8x1xf32>
      %cst_81 = arith.constant dense<0.000000e+00> : vector<1xf32>
      %187 = vector.multi_reduction <add>, %186, %cst_81 [1, 2] : vector<1x8x1xf32> to vector<1xf32>
      %188 = vector.shape_cast %187 : vector<1xf32> to vector<1x1x1xf32>
      %189 = vector.extract %188[0, 0, 0] : f32 from vector<1x1x1xf32>
      %190 = arith.addf %173, %189 : f32
      %c0_82 = arith.constant 0 : index
      %c0_83 = arith.constant 0 : index
      %c0_84 = arith.constant 0 : index
      %191 = vector.load %arg4[%c0_82, %c0_83, %c0_84] : memref<1x8x1xi32, #tpu.memory_space<vmem>>, vector<1x8x1xi32>
      %192 = vector.shape_cast %191 : vector<1x8x1xi32> to vector<8x1xi32>
      %c3_i32 = arith.constant 3 : i32
      %193 = vector.broadcast %c3_i32 : i32 to vector<8x1xi32>
      %194 = arith.cmpi eq, %192, %193 : vector<8x1xi32>
      %cst_85 = arith.constant -3.40282347E+38 : f32
      %195 = vector.broadcast %cst_85 : f32 to vector<8x1xf32>
      %196 = arith.select %194, %151, %195 : vector<8x1xi1>, vector<8x1xf32>
      %197 = arith.cmpf ogt, %196, %150 : vector<8x1xf32>
      %198 = arith.extui %197 : vector<8x1xi1> to vector<8x1xi32>
      %199 = arith.sitofp %198 : vector<8x1xi32> to vector<8x1xf32>
      %cst_86 = arith.constant -3.40282347E+38 : f32
      %200 = vector.broadcast %cst_86 : f32 to vector<8x1xf32>
      %201 = arith.select %194, %153, %200 : vector<8x1xi1>, vector<8x1xf32>
      %202 = arith.cmpf ogt, %201, %152 : vector<8x1xf32>
      %203 = arith.extui %202 : vector<8x1xi1> to vector<8x1xi32>
      %204 = arith.sitofp %203 : vector<8x1xi32> to vector<8x1xf32>
      %205 = tpu.iota {dimensions = array<i32: 1>} : vector<8x128xi32>
      %c4_i32 = arith.constant 4 : i32
      %206 = vector.broadcast %c4_i32 : i32 to vector<8x128xi32>
      %207 = arith.cmpi eq, %205, %206 : vector<8x128xi32>
      %208 = vector.shape_cast %199 : vector<8x1xf32> to vector<8x1xf32>
      %209 = vector.broadcast %208 : vector<8x1xf32> to vector<8x128xf32>
      %210 = arith.select %207, %209, %149 : vector<8x128xi1>, vector<8x128xf32>
      %c5_i32 = arith.constant 5 : i32
      %211 = vector.broadcast %c5_i32 : i32 to vector<8x128xi32>
      %212 = arith.cmpi eq, %205, %211 : vector<8x128xi32>
      %213 = vector.shape_cast %204 : vector<8x1xf32> to vector<8x1xf32>
      %214 = vector.broadcast %213 : vector<8x1xf32> to vector<8x128xf32>
      %215 = arith.select %212, %214, %210 : vector<8x128xi1>, vector<8x128xf32>
      %c6_i32 = arith.constant 6 : i32
      %216 = vector.broadcast %c6_i32 : i32 to vector<8x128xi32>
      %217 = arith.cmpi eq, %205, %216 : vector<8x128xi32>
      %218 = vector.broadcast %190 : f32 to vector<8x128xf32>
      %219 = arith.select %217, %218, %215 : vector<8x128xi1>, vector<8x128xf32>
      %c0_87 = arith.constant 0 : index
      %c0_88 = arith.constant 0 : index
      %c0_89 = arith.constant 0 : index
      %220 = vector.load %arg22[%c0_87, %c0_88, %c0_89] : memref<1x8x128xf32, #tpu.memory_space<vmem>>, vector<1x8x128xf32>
      %221 = vector.shape_cast %220 : vector<1x8x128xf32> to vector<8x128xf32>
      %222 = vector.shape_cast %219 : vector<8x128xf32> to vector<1x8x128xf32>
      tpu.vector_store %arg22[%c0_87, %c0_88, %c0_89], %222 {strides = array<i32>} : memref<1x8x128xf32, #tpu.memory_space<vmem>>, vector<1x8x128xf32>,
    } else {
    }
    return
  }
  func.func @transform_0(%arg0: i32, %arg1: i32) -> (i32, i32, i32) {
    %c0_i32 = arith.constant 0 : i32
    %c0_i32_0 = arith.constant 0 : i32
    %c0_i32_1 = arith.constant 0 : i32
    return %arg0, %c0_i32, %c0_i32_0 : i32, i32, i32
  }
  func.func @transform_1(%arg0: i32, %arg1: i32) -> (i32, i32, i32) {
    %c0_i32 = arith.constant 0 : i32
    %c0_i32_0 = arith.constant 0 : i32
    %c0_i32_1 = arith.constant 0 : i32
    return %arg0, %c0_i32, %c0_i32_0 : i32, i32, i32
  }
  func.func @transform_2(%arg0: i32, %arg1: i32) -> (i32, i32, i32) {
    %c0_i32 = arith.constant 0 : i32
    %c0_i32_0 = arith.constant 0 : i32
    %c0_i32_1 = arith.constant 0 : i32
    return %arg0, %c0_i32, %c0_i32_0 : i32, i32, i32
  }
  func.func @transform_3(%arg0: i32, %arg1: i32) -> (i32, i32, i32) {
    %c0_i32 = arith.constant 0 : i32
    %c0_i32_0 = arith.constant 0 : i32
    %c0_i32_1 = arith.constant 0 : i32
    return %arg0, %c0_i32, %c0_i32_0 : i32, i32, i32
  }
  func.func @transform_4(%arg0: i32, %arg1: i32) -> (i32, i32) {
    %c0_i32 = arith.constant 0 : i32
    %c0_i32_0 = arith.constant 0 : i32
    %c0_i32_1 = arith.constant 0 : i32
    return %c0_i32, %c0_i32_0 : i32, i32
  }
  func.func @transform_5(%arg0: i32, %arg1: i32) -> (i32, i32) {
    %c0_i32 = arith.constant 0 : i32
    %c0_i32_0 = arith.constant 0 : i32
    %c0_i32_1 = arith.constant 0 : i32
    return %c0_i32, %c0_i32_0 : i32, i32
  }
  func.func @transform_6(%arg0: i32, %arg1: i32) -> (i32, i32, i32) {
    %c0_i32 = arith.constant 0 : i32
    %c0_i32_0 = arith.constant 0 : i32
    %c0_i32_1 = arith.constant 0 : i32
    return %arg1, %c0_i32, %c0_i32_0 : i32, i32, i32
  }
  func.func @transform_7(%arg0: i32, %arg1: i32) -> (i32, i32, i32) {
    %c0_i32 = arith.constant 0 : i32
    %c0_i32_0 = arith.constant 0 : i32
    %c0_i32_1 = arith.constant 0 : i32
    return %arg1, %c0_i32, %c0_i32_0 : i32, i32, i32
  }
  func.func @transform_8(%arg0: i32, %arg1: i32) -> (i32, i32, i32) {
    %c0_i32 = arith.constant 0 : i32
    %c0_i32_0 = arith.constant 0 : i32
    %c0_i32_1 = arith.constant 0 : i32
    return %arg1, %c0_i32, %c0_i32_0 : i32, i32, i32
  }
  func.func @transform_9(%arg0: i32, %arg1: i32) -> (i32, i32, i32) {
    %c0_i32 = arith.constant 0 : i32
    %c0_i32_0 = arith.constant 0 : i32
    %c0_i32_1 = arith.constant 0 : i32
    return %arg1, %c0_i32, %c0_i32_0 : i32, i32, i32
  }
  func.func @transform_10(%arg0: i32, %arg1: i32) -> (i32, i32, i32) {
    %c0_i32 = arith.constant 0 : i32
    %c0_i32_0 = arith.constant 0 : i32
    %c0_i32_1 = arith.constant 0 : i32
    return %arg1, %c0_i32, %c0_i32_0 : i32, i32, i32
  }
  func.func @transform_11(%arg0: i32, %arg1: i32) -> (i32, i32, i32) {
    %c0_i32 = arith.constant 0 : i32
    %c0_i32_0 = arith.constant 0 : i32
    %c0_i32_1 = arith.constant 0 : i32
    return %arg1, %c0_i32, %c0_i32_0 : i32, i32, i32
  }
  func.func @transform_12(%arg0: i32, %arg1: i32) -> (i32, i32, i32) {
    %c0_i32 = arith.constant 0 : i32
    %c0_i32_0 = arith.constant 0 : i32
    %c0_i32_1 = arith.constant 0 : i32
    return %arg1, %c0_i32, %c0_i32_0 : i32, i32, i32
  }
  func.func @transform_13(%arg0: i32, %arg1: i32) -> (i32, i32, i32) {
    %c0_i32 = arith.constant 0 : i32
    %c0_i32_0 = arith.constant 0 : i32
    %c0_i32_1 = arith.constant 0 : i32
    return %arg1, %c0_i32, %c0_i32_0 : i32, i32, i32
  }
  func.func @transform_14(%arg0: i32, %arg1: i32) -> (i32, i32, i32) {
    %c0_i32 = arith.constant 0 : i32
    %c0_i32_0 = arith.constant 0 : i32
    %c0_i32_1 = arith.constant 0 : i32
    return %arg1, %c0_i32, %c0_i32_0 : i32, i32, i32
  }
  func.func @transform_15(%arg0: i32, %arg1: i32) -> (i32, i32, i32) {
    %c0_i32 = arith.constant 0 : i32
    %c0_i32_0 = arith.constant 0 : i32
    %c0_i32_1 = arith.constant 0 : i32
    return %arg1, %c0_i32, %c0_i32_0 : i32, i32, i32
  }
  func.func @transform_16(%arg0: i32, %arg1: i32) -> (i32, i32, i32) {
    %c0_i32 = arith.constant 0 : i32
    %c0_i32_0 = arith.constant 0 : i32
    %c0_i32_1 = arith.constant 0 : i32
    return %arg1, %c0_i32, %c0_i32_0 : i32, i32, i32
  }
  func.func @transform_17(%arg0: i32, %arg1: i32) -> (i32, i32, i32) {
    %c0_i32 = arith.constant 0 : i32
    %c0_i32_0 = arith.constant 0 : i32
    %c0_i32_1 = arith.constant 0 : i32
    return %arg1, %c0_i32, %c0_i32_0 : i32, i32, i32
  }
  func.func @transform_18(%arg0: i32, %arg1: i32) -> (i32, i32) {
    %c0_i32 = arith.constant 0 : i32
    %c0_i32_0 = arith.constant 0 : i32
    %c0_i32_1 = arith.constant 0 : i32
    return %c0_i32, %c0_i32_0 : i32, i32
  }
  func.func @transform_19(%arg0: i32, %arg1: i32) -> (i32, i32) {
    %c0_i32 = arith.constant 0 : i32
    %c0_i32_0 = arith.constant 0 : i32
    %c0_i32_1 = arith.constant 0 : i32
    return %c0_i32, %c0_i32_0 : i32, i32
  }
  func.func @transform_20(%arg0: i32, %arg1: i32) -> (i32, i32, i32) {
    %c0_i32 = arith.constant 0 : i32
    %c0_i32_0 = arith.constant 0 : i32
    %c0_i32_1 = arith.constant 0 : i32
    return %arg0, %c0_i32, %c0_i32_0 : i32, i32, i32
  }
}

</mosaic_0001>

<bundles_post_ra>
// kernel: tpu_custom_call.1
= control target key start
LH: loop header
LB: loop body
LE: loop exit
PB: predicated region body
PF: predicated region fallthrough
CT: control target
= control target key end

     0   :  { %s3553_s0 = inlined_call_operand.vmem [shape: bf16[2,8,32], index: 0, kind: input, shape index: {}]   ;;  %s3554_s1 = inlined_call_operand.vmem [shape: s32[2,1,8], index: 1, kind: input, shape index: {}]   ;;  %s3555_s2 = inlined_call_operand.vmem [shape: s32[2,8,1], index: 2, kind: input, shape index: {}]   ;;  %s3556_s3 = inlined_call_operand.vmem [shape: s32[2,8,2], index: 3, kind: input, shape index: {}]   ;;  %s3557_s4 = inlined_call_operand.hbm [shape: f32[1,32], index: 4, kind: input, shape index: {}]   ;;  %s3558_s5 = inlined_call_operand.hbm [shape: f32[1,32], index: 5, kind: input, shape index: {}]   ;;  %s3559_s6 = inlined_call_operand.vmem [shape: bf16[2,32,96], index: 6, kind: input, shape index: {}]   ;;  %s3560_s7 = inlined_call_operand.vmem [shape: f32[2,1,96], index: 7, kind: input, shape index: {}]   ;;  %s3561_s8 = inlined_call_operand.vmem [shape: bf16[2,32,32], index: 8, kind: input, shape index: {}]   ;;  %s3562_s9 = inlined_call_operand.vmem [shape: f32[2,1,32], index: 9, kind: input, shape index: {}]   ;;  %s3563_s10 = inlined_call_operand.vmem [shape: f32[2,1,32], index: 10, kind: input, shape index: {}]   ;;  %s3564_s11 = inlined_call_operand.vmem [shape: f32[2,1,32], index: 11, kind: input, shape index: {}]   ;;  %s3565_s12 = inlined_call_operand.vmem [shape: bf16[2,32,64], index: 12, kind: input, shape index: {}]   ;;  %s3566_s13 = inlined_call_operand.vmem [shape: f32[2,1,64], index: 13, kind: input, shape index: {}]   ;;  %s3567_s14 = inlined_call_operand.vmem [shape: bf16[2,64,32], index: 14, kind: input, shape index: {}]   ;;  %s3568_s15 = inlined_call_operand.vmem [shape: f32[2,1,32], index: 15, kind: input, shape index: {}]   ;;  %s3569_s16 = inlined_call_operand.vmem [shape: f32[2,1,32], index: 16, kind: input, shape index: {}]   ;;  %s3570_s17 = inlined_call_operand.vmem [shape: f32[2,1,32], index: 17, kind: input, shape index: {}]   ;;  %s3571_s18 = inlined_call_operand.vmem [shape: bf16[32,128], index: 18, kind: input, shape index: {}]   ;;  %s3572_s19 = inlined_call_operand.vmem [shape: f32[1,128], index: 19, kind: input, shape index: {}]   ;;  %s3573_s20 = inlined_call_operand.hbm [shape: f32[2,8,128], index: 20, kind: output, shape index: {}]  }
   0x1   :  { %3596 = sst [smem:[#allocation27_spill]] %s3553_s0 }
   0x2   :  { %3597 = sst [smem:[#allocation28_spill]] %s3554_s1 }
   0x3   :  { %3598 = sst [smem:[#allocation29_spill]] %s3555_s2 }
   0x4   :  { %3599 = sst [smem:[#allocation30_spill]] %s3556_s3 }
   0x5   :  { %3600 = sst [smem:[#allocation31_spill]] %s3557_s4 }
   0x6   :  { %3601 = sst [smem:[#allocation32_spill]] %s3558_s5 }
   0x7   :  { %3602 = sst [smem:[#allocation33_spill]] %s3559_s6 }
   0x8   :  { %3603 = sst [smem:[#allocation34_spill]] %s3561_s8 }
   0x9   :  { %3604 = sst [smem:[#allocation35_spill]] %s3564_s11 }
   0xa   :  { %3605 = sst [smem:[#allocation36_spill]] %s3565_s12 }
   0xb   :  { %3606 = sst [smem:[#allocation37_spill]] %s3569_s16 }
   0xc   :  { %3607 = sst [smem:[#allocation38_spill]] %s3570_s17 }
   0xd   :  { %3608 = sst [smem:[#allocation39_spill]] %s3571_s18 }
   0xe   :  { %3609 = sst [smem:[#allocation40_spill]] %s3572_s19 }
   0xf   :  { %3610 = sst [smem:[#allocation41_spill]] %s3573_s20 }
  0x10   :  { %25 = vsyncpa [#allocation4], 0 }
  0x11   :  { %26 = vsyncpa [#allocation7], 0 }
  0x12   :  { %27 = vsyncpa [#allocation5], 0 }
  0x13   :  { %29 = vsyncpa [#allocation5 + $0x1], 0  ;;  %s3043_s1 = smov 0   ;;  %s3045_s22 = smov 0  }
  0x14   :  { %s3047_s23 = smov 0   ;;  %s3049_s24 = smov 0  }
  0x15   :  { %s3051_s2 = smov 0   ;;  %s3053_s25 = smov 0  }
  0x16   :  { %s3055_s3 = smov 0   ;;  %s3057_s26 = smov 0  }
  0x17 LB: > { %3611 = sst [smem:[#allocation12_spill]] %s2889_s1  ;;  %s2440_s27 = sadd.s32 4294967295, %s2917_s26   ;;  %s2917_s26 = sphi %s3057_s26, %s35_s26   ;;  %s2913_s3 = sphi %s3055_s3, %s3676_s3   ;;  %s2909_s25 = sphi %s3053_s25, %s3675_s25   ;;  %s2905_s2 = sphi %s3051_s2, %s3674_s2   ;;  %s2901_s24 = sphi %s3049_s24, %s3673_s24   ;;  %s2897_s23 = sphi %s3047_s23, %s3672_s23   ;;  %s2893_s22 = sphi %s3045_s22, %s3671_s22   ;;  %s2889_s1 = sphi %s3043_s1, %s3670_s1  }
  0x18   : > { %3612 = sst [smem:[#allocation13_spill]] %s2893_s22  ;;  %s2441_s28 = sadd.s32 4294967294, %s2917_s26  }
  0x19   : > { %3613 = sst [smem:[#allocation14_spill]] %s2897_s23  ;;  %s44_s4 = sadd.s32 1, %s2909_s25 }
  0x1a   : > { %3614 = sst [smem:[#allocation15_spill]] %s2901_s24  ;;  %s47_s29 = sadd.s32 1, %s2913_s3 }
  0x1b   : > { %3615 = sst [smem:[#allocation16_spill]] %s2905_s2  ;;  %p45_p0 = scmp.ge.s32.totalorder %s44_s4, 2 }
  0x1c   : > { %3616 = sst [smem:[#allocation17_spill]] %s2909_s25  ;;  %s554_s30 = sadd.s32 1, %s2897_s23 }
  0x1d   : > { %3617 = sst [smem:[#allocation18_spill]] %s2913_s3  ;;  %p564_p1 = scmp.ne.s32.totalorder %s2897_s23, %s2893_s22 }
  0x1e   : > { %3618 = sst [smem:[#allocation19_spill]] %s2917_s26  ;;  %p565_p2 = scmp.eq.s32.totalorder %s2440_s27, 3 }
  0x1f   : > { %s3678_s4 = smov (%p45_p0, %s44_s4), 0  ;;  %s3680_s29 = smov (!%p45_p0, %s47_s29), %s2913_s3 }
  0x20   : > { %3619 = sst [smem:[#allocation20_spill]] %s3678_s4  ;;  %p3093_p3 = por %p565_p2, %p564_p1 }
  0x21   : > { %p570_p4 = scmp.ne.s32.totalorder %s2893_s22, %s2889_s1  ;;  %p49_p5 = scmp.ge.s32.totalorder %s3680_s29, 2 }
  0x22   : > { %s3620_s0 = scalar_select %p3093_p3, 1, 0 }
  0x23   : > { %p571_p6 = scmp.eq.s32.totalorder %s2441_s28, 3  ;;  %p2442_p7 = scmp.ge.s32.totalorder %s2917_s26, 1 }
  0x24   : > { %3621 = sst [smem:[#allocation21_spill]] %s3620_s0  ;;  %p578_p8 = scmp.lt.s32.totalorder %s2917_s26, 5 }
  0x25   : > { %s3682_s29 = smov (%p49_p5, %s3680_s29), 0  ;;  %p3103_p9 = por %p571_p6, %p570_p4 }
  0x26   : > { %3622 = sst [smem:[#allocation22_spill]] %s3682_s29  ;;  %p3107_p10 = pnand %p2442_p7, %p578_p8 }
  0x27   : > { %s3623_s21 = scalar_select %p3103_p9, 1, 0 }
  0x28   : > { %s3625_s25 = scalar_select %p3107_p10, 1, 0 }
  0x29   : > { %3624 = sst [smem:[#allocation23_spill]] %s3623_s21  ;;  %s551_s4 = ssub.s32 %s2913_s3, %s3682_s29 }
  0x2a   : > { %p552_p11 = scmp.eq.s32.totalorder %s551_s4, 0  ;;  %p2620_p12 = pneg %p3107_p10 }
  0x2b   : > { %p3115_p13 = scmp.eq.s32.totalorder %s2440_s27, 0  ;;  %s2919_s26 = smov [#allocation3]  }
  0x2c   : > { %s3120_s1 = scalar_select %p552_p11, %s2897_s23, %s554_s30  }
  0x2d   : > { %s3626_s28 = scalar_select %p3115_p13, 1, 0 }
  0x2e   : > { %3627 = sst [smem:[#allocation24_spill]] %s3120_s1  ;;  %s591_s20 = sshll.u32 %s2919_s26, 4  ;;  %s592_s20 = int_to_ptr.vmem [resolvable:$true] %s591_s20 }
  0x2f   : > { %p3124_p0 = pnand %p3115_p13, %p2620_p12  ;;  %s2920_s4 = smov [#allocation6]  }
  0x30   : > { %s602_s29 = sshll.u32 %s2920_s4, 4  ;;  %s3629_s0 = sld [smem:[#allocation31_spill]]  ;;  %s603_s29 = int_to_ptr.vmem [resolvable:$true] %s602_s29 }
  0x31   : > { %p2761_p2 = pneg %p3124_p0 }
  0x36   : > { %s2759_s19 = scalar_lea.hbm %s3629_s0, 16 }
  0x37   : > { %p2760_p1 = scmp.ne.s32.totalorder %s3629_s0, %s2759_s19  ;;  %p2766_p6 = scmp.lt.u32.totalorder %s2759_s19, %s3629_s0 }
  0x39   : > { %p2762_p4 = pnand %p2761_p2, %p2760_p1 }
  0x3b   : > { %p2763_p5 = pneg %p2762_p4 }
  0x3d   : > { %p2768_p7 = pnand %p2766_p6, %p2763_p5 }
  0x3f   : > { %2771 = shalt.err (!%p2768_p7)
}
  0x40   : > { %s2772_s4 = scalar_lea.vmem %s592_s20, 16  ;;  %s2779_s17 = scalar_lea.vmem %s592_s20, 32 }
  0x41   : > { %p2773_p8 = scmp.ne.s32.totalorder %s592_s20, %s2772_s4  ;;  %p2780_p9 = scmp.lt.s32.totalorder %s592_s20, %s592_s20 }
  0x42   : > { %p2781_p3 = scmp.lt.s32.totalorder %s2779_s17, %s2772_s4 }
  0x43   : > { %p2775_p11 = pnand %p2773_p8, %p2761_p2 }
  0x44   : > { %p2782_p13 = por %p2781_p3, %p2780_p9 }
  0x45   : > { %p2776_p12 = pneg %p2775_p11 }
  0x47   : > { %p2783_p10 = pnand %p2782_p13, %p2776_p12 }
  0x49   : > { %2786 = shalt.err (!%p2783_p10)
}
  0x4a   : > { %2623 = dma.hbm_to_vmem [thread:$0]  (!%p3124_p0), %s3629_s0, 16, %s592_s20, [#allocation4]  }
  0x4b   : > { %s3630_s5 = sld [smem:[#allocation32_spill]] }
  0x51   : > { %s2787_s26 = scalar_lea.hbm %s3630_s5, 16 }
  0x52   : > { %p2788_p1 = scmp.ne.s32.totalorder %s3630_s5, %s2787_s26  ;;  %p2794_p10 = scmp.lt.u32.totalorder %s2787_s26, %s3630_s5 }
  0x54   : > { %p2790_p3 = pnand %p2788_p1, %p2761_p2 }
  0x56   : > { %p2791_p9 = pneg %p2790_p3 }
  0x58   : > { %p2796_p13 = pnand %p2794_p10, %p2791_p9 }
  0x5a   : > { %2799 = shalt.err (!%p2796_p13)
}
  0x5b   : > { %s2800_s20 = scalar_lea.vmem %s603_s29, 16  ;;  %s2807_s18 = scalar_lea.vmem %s603_s29, 32 }
  0x5c   : > { %p2801_p4 = scmp.ne.s32.totalorder %s603_s29, %s2800_s20  ;;  %p2808_p7 = scmp.lt.s32.totalorder %s603_s29, %s603_s29 }
  0x5d   : > { %p2809_p8 = scmp.lt.s32.totalorder %s2807_s18, %s2800_s20 }
  0x5e   : > { %p2803_p5 = pnand %p2801_p4, %p2761_p2 }
  0x5f   : > { %p2810_p11 = por %p2809_p8, %p2808_p7 }
  0x60   : > { %p2804_p6 = pneg %p2803_p5 }
  0x62   : > { %p2811_p12 = pnand %p2810_p11, %p2804_p6 }
  0x64   : > { %2814 = shalt.err (!%p2811_p12)
}
  0x65   : > { %2626 = dma.hbm_to_vmem [thread:$0]  (!%p3124_p0), %s3630_s5, 16, %s603_s29, [#allocation7]  }
  0x66   : > { %p3631_p1 = scmp.ne.s32.totalorder %s3625_s25, 0 }
  0x68   : > { %728 = sbr.rel (%p3631_p1) target bundleno = 4088 (0xff8), region = 100 }
  0x6f   : > { %p3632_p3 = scmp.ne.s32.totalorder %s3626_s28, 0 }
  0x71   : > { %2876 = dma.done.wait (%p3632_p3), [#allocation4], 16  }
  0x72   : > { %2878 = vsyncadd (%p3632_p3), [#allocation4], 4294967280 }
  0x73   : > { %2880 = dma.done.wait (%p3632_p3), [#allocation7], 16  }
  0x74   : > { %2882 = vsyncadd (%p3632_p3), [#allocation7], 4294967280  ;;  %s3590_s25 = sand.u32 1, %s2893_s22   ;;  %p844_p0 = scmp.lt.s32.totalorder %s2905_s2, 1 }
  0x75   : > { %s3184_s29 = sshll.u32 %s3590_s25, 3  ;;  %p859_p2 = scmp.lt.s32.totalorder %s2901_s24, 1 }
  0x76   : > { %s3188_s21 = scalar_select %p844_p0, %s2905_s2, 1 }
  0x77   : > { %s3191_s19 = scalar_select %p859_p2, %s2901_s24, 1 }
  0x78   : > { %s2450_s28 = sshll.u32 %s3188_s21, 2  ;;  %s3634_s18 = sld [smem:[#allocation27_spill]] }
  0x79   : > { %s2451_s3 = sshll.u32 %s3188_s21, 3  ;;  %s3635_s5 = sld [smem:[#allocation29_spill]] }
  0x7a   : > { %s3637_s24 = sld [smem:[#allocation30_spill]]  ;;  %s2509_s27 = sshll.u32 %s3191_s19, 4 }
  0x7b   : > { %s3639_s6 = sld [smem:[#allocation33_spill]]  ;;  %s3640_s8 = sld [smem:[#allocation34_spill]] }
  0x7c   : > { %s3642_s12 = sld [smem:[#allocation36_spill]]  ;;  %s896_s26 = scalar_lea.vmem %s3568_s15, %s3191_s19 }
  0x7d   : > { %s843_s0 = scalar_lea.vmem [#allocation8], %s3184_s29  ;;  %s3645_s25 = sld [smem:[#allocation15_spill]] }
  0x7e   : > { %s847_s1 = scalar_lea.vmem %s3634_s18, %s2450_s28 }
  0x7f   : > { %s3205_s23 = scalar_lea.vmem %s3635_s5, %s2451_s3 }
  0x80   : > { %3636 = sst [smem:[#allocation25_spill]] %s3205_s23  ;;  %s3210_s16 = scalar_lea.vmem %s3637_s24, %s2451_s3 }
  0x81   : > { %3638 = sst [smem:[#allocation26_spill]] %s3210_s16  ;;  %s3220_s18 = scalar_lea.vmem %s3639_s6, %s2509_s27 }
  0x82   : > { %s3225_s5 = scalar_lea.vmem %s3640_s8, %s2509_s27  ;;  %s3242_s6 = scalar_lea.vmem %s3642_s12, %s2509_s27 }
  0x83   : > { %s888_s8 = scalar_lea.vmem %s3566_s13, %s3191_s19  ;;  %s2512_s16 = sshll.u32 %s3191_s19, 5 }
  0x84   : > { %s3252_s24 = scalar_lea.vmem %s3567_s14, %s2512_s16  ;;  %s3643_s23 = sld [smem:[#allocation37_spill]] }
  0x85   : > { %s3644_s12 = sld [smem:[#allocation38_spill]]  ;;  %p2461_p9 = scmp.ne.s32.totalorder %s3645_s25, 0 }
  0x86   : > { %v908_v0 = vld [vmem:[%s847_s1] sm:$0xf] (!%p2461_p9)  ;;  %vm912_vm0 = vcmask (!%p2461_p9), 261120   ;;  %v2462_v12 = vld [vmem:[#allocation3] ss:$0 sm:$0xff] (!%p2461_p9)  ;;  %vm942_vm1 = vcmask (!%p2461_p9), 257024  }
  0x87   : > { %907 = sbr.rel (%p2461_p9) target bundleno = 453 (0x1c5), region = 112  ;;  %v909_v1 = vunpack.c.l.bf16 (!%p2461_p9), %v908_v0  ;;  %v2463_v14 = vld [vmem:[#allocation6] ss:$0 sm:$0xff] (!%p2461_p9) }
  0x89   : > { %v913_v2 = vsel (!%p2461_p9), %vm912_vm0, %v909_v1, 0.0 }
  0x8a   : > { %s899_s28 = scalar_lea.vmem %s3643_s23, %s3191_s19  ;;  %914 = vadd.xlane.f32.xlu0 (!%p2461_p9), %v913_v2 }
  0x8b   : > { %s902_s11 = scalar_lea.vmem %s3644_s12, %s3191_s19 }
 0x117   : > { %v915_v3 = vpop.xlane.xlu0 %914 }
 0x118   : > { %v917_v4 = vmul.f32 0.03125, %v915_v3 }
 0x11a   : > { %v918_v5 = vsub.f32 %v909_v1, %v917_v4 }
 0x11c   : > { %v919_v6 = vmul.f32 %v918_v5, %v918_v5 }
 0x11e   : > { %v920_v7 = vsel %vm912_vm0, %v919_v6, 0.0 }
 0x11f   : > { %921 = vadd.xlane.f32.xlu0 %v920_v7 }
 0x1ac   : > { %v922_v8 = vpop.xlane.xlu0 %921 }
 0x1ad   : > { %v923_v9 = vmul.f32 0.03125, %v922_v8 }
 0x1af   : > { %v924_v10 = vadd.f32 1e-12, %v923_v9 }
 0x1b1   : > { %2718 = vrsqrt.f32 %v924_v10 }
 0x1bb   : > { %v2719_v11 = vpop.eup %2718 }
 0x1bc   : > { %v926_v13 = vmul.f32 %v2719_v11, %v918_v5 }
 0x1be   : > { %v933_v15 = vmul.f32 %v2462_v12, %v926_v13 }
 0x1c0   : > { %v940_v16 = vadd.f32 %v2463_v14, %v933_v15 }
 0x1c2   : > { %v941_v17 = vpack.c.bf16 %v940_v16, %v940_v16 }
 0x1c4   : > { %943 = vst.msk [vmem:[#allocation2] sm:$0xf] %vm942_vm1, %v941_v17 }
 0x1c5 PF: > { %v2720_v18 = vld [vmem:[%s3220_s18] sm:$0xff]   ;;  %v2921_v19 = vmov 0.0   ;;  %v2721_v20 = vld [vmem:[%s3220_s18 + $0x8] sm:$0xff]   ;;  %vm2922_vm2 = vmmov 0   ;;  %vm969_vm3 = vcmask 261120   ;;  %s3646_s23 = scalar_lea.vmem %s3560_s7, %s3191_s19  ;;  %s2923_s1 = smov 112   ;;  %v1021_v31 = vlaneseq }
 0x1c6   : > { %2538 = vmatprep.subr.bf16.mxu0 %v2921_v19  ;;  %2546 = vmatprep.subr.bf16.mxu1 %v2921_v19  ;;  %v2464_v22 = vld [vmem:[%s3646_s23] ss:$0 sm:$0xff]  ;;  %s2924_s17 = smov 96   ;;  %v2925_v29 = vmov 1983009808   ;;  %vm1392_vm4 = vcmask 130048   ;;  %s3649_s27 = scalar_lea.vmem %s3562_s9, %s3191_s19 }
 0x1c7   : > { %2539 = vmatpush3.bf16.msra.mxu0 %v2720_v18  ;;  %2542 = vmatprep.mubr.msk.bf16.mxu0 %vm2922_vm2, %v2921_v19  ;;  %v1019_v30 = vunpack.c.l.s4 %v2925_v29  ;;  %v3297_v33 = vshrl.u32 %v1021_v31, 7  ;;  %v2926_v37 = vmov 1934713408   ;;  %s3647_s22 = sld [smem:[#allocation28_spill]]  ;;  %vm1485_vm6 = vcmask 64512   ;;  %s3650_s12 = scalar_lea.vmem %s3563_s10, %s3191_s19 }
 0x1c8   : > { %2540 = vmatprep.subr.bf16.mxu0 %v2921_v19  ;;  %2548 = vmatprep.mubr.msk.bf16.mxu1 %vm2922_vm2, %v2921_v19  ;;  %v1050_v38 = vunpack.c.l.s4 %v2926_v37  ;;  %vm1513_vm7 = vcmask 1043456   ;;  %vm1938_vm8 = vcmask 523264   ;;  %vm2013_vm9 = vcmask 257024   ;;  %s3655_s3 = sld [smem:[#allocation15_spill]] }
 0x1c9   : > { %v1020_v32 = vunpack.c.0.s8 %v1019_v30 }
 0x1ca   : > { %v1051_v40 = vunpack.c.0.s8 %v1050_v38 }
 0x1cb   : > { %v3277_v21 = vld [vmem:[#allocation2] sm:$0xf]  ;;  %2541 = vmatpush3.bf16.msra.mxu0 %v2721_v20  ;;  %v3304_v36 = vsub.s32 %v1020_v32, %v3297_v33 }
 0x1cc   : > { %2552 = vmatprep.subr.bf16.mxu0 %v2921_v19  ;;  %v3314_v48 = vsub.s32 %v1051_v40, %v3297_v33 }
 0x1cd   : > { %s3648_s2 = scalar_lea.vmem %s3647_s22, %s3188_s21  ;;  %s2928_s21 = smov 64  }
 0x1ce   : > { %2543 = vmatmul.mubr.msk.bf16.vlgmr.msra.gmra.mrb[0].mxu0 %vm969_vm3, %v3277_v21  ;;  %p2498_p10 = scmp.ne.s32.totalorder %s3655_s3, 1 }
 0x1cf   : > { %2554 = vmatprep.mubr.msk.bf16.mxu0 %vm2922_vm2, %v2921_v19  ;;  %s3656_s20 = sld [smem:[#allocation39_spill]] (!%p2498_p10)  ;;  %vm2931_vm10 = vmmov (!%p2498_p10), 0   ;;  %s3658_s16 = sld [smem:[#allocation40_spill]] (!%p2498_p10)  ;;  %vm2113_vm12 = vcmask (!%p2498_p10), 7168  }
 0x1d0   : > { %s2932_s23 = smov (!%p2498_p10), 126   ;;  %s2935_s18 = smov (!%p2498_p10), 125  }
 0x2a1   : > { %v1007_v23 = vpop.f32.mrb[0].mxu0 }
 0x2a2   : > { %v3289_v24 = vadd.f32 %v2464_v22, %v1007_v23  ;;  %v2544_v25 = vpop.f32.mrb[1].mxu0 }
 0x2a3   : > { %v1010_v26 = vpop.f32.mrb[2].mxu0 }
 0x2a4   : > { %1014 = vrot.lane.b32.xlu0 %v3289_v24, %s2923_s1  ;;  %v2545_v27 = vpop.f32.mrb[3].mxu0  ;;  %v1017_v35 = vcombine.high %v3289_v24, %v2921_v19  ;;  %v1024_v44 = vrot.slane %v3289_v24, %v3304_v36 }
 0x2a6   : > { %v1031_v41 = vrot.slane %v1017_v35, %v3304_v36 }
 0x2a8   : > { %1135 = vrot.lane.b32.xlu0 %v3289_v24, %s2924_s17 }
 0x316   : > { %v3293_v28 = vpop.permute.xlu0 %1014 }
 0x317   : > { %1137 = vrot.lane.b32.xlu1 %v3293_v28, %s2924_s17  ;;  %v1032_v34 = vcombine.high %v3293_v28, %v2921_v19  ;;  %v1039_v42 = vrot.slane %v3293_v28, %v3304_v36  ;;  %s3659_s17 = sld [smem:[#allocation25_spill]] (!%p2498_p10) }
 0x319   : > { %v1046_v39 = vrot.slane %v1032_v34, %v3304_v36  ;;  %v1047_v49 = vcombine.low %v1024_v44, %v1039_v42  ;;  %v1048_v50 = vcombine.high %v1024_v44, %v1039_v42 }
 0x31a   : > { %v1136_v43 = vpop.permute.xlu0 %1135 }
 0x31b   : > { %v1063_v45 = vcombine.low %v1031_v41, %v1046_v39  ;;  %v1064_v46 = vcombine.high %v1031_v41, %v1046_v39  ;;  %v1141_v47 = vcombine.high %v1136_v43, %v2921_v19  ;;  %v1148_v52 = vrot.slane %v1136_v43, %v3304_v36 }
 0x31c   : > { %v1055_v61 = vrot.slane %v1047_v49, %v3314_v48  ;;  %v1062_v62 = vrot.slane %v1048_v50, %v3314_v48  ;;  %v2927_v49 = vmov -1e+09  }
 0x31d   : > { %v1071_v55 = vrot.slane %v1063_v45, %v3314_v48  ;;  %v1078_v56 = vrot.slane %v1064_v46, %v3314_v48  ;;  %v1155_v57 = vrot.slane %v1141_v47, %v3304_v36  ;;  %v1383_v46 = vld [vmem:[%s3648_s2] sm:$0x1]  ;;  %v1389_v47 = vsub.s32 0, %v3297_v33 }
 0x31e   : > { %v1083_v9 = vcombine.low %v1055_v61, %v1062_v62  ;;  %v2468_v10 = vcombine.high %v1055_v61, %v1062_v62  ;;  %vm1384_vm5 = vcmp.gt.s32.totalorder %v1383_v46, 0 }
 0x31f   : > { %v1099_v3 = vcombine.low %v1071_v55, %v1078_v56  ;;  %v2469_v4 = vcombine.high %v1071_v55, %v1078_v56  ;;  %v1385_v50 = vsel %vm1384_vm5, 0.0, %v2927_v49 }
 0x320   : > { %v1090_v22 = vrot.slane %v1083_v9, %v3304_v36  ;;  %v1098_v23 = vrot.slane %v2468_v10, %v3304_v36 }
 0x321   : > { %v1106_v15 = vrot.slane %v1099_v3, %v3304_v36  ;;  %v1114_v20 = vrot.slane %v2469_v4, %v3304_v36 }
 0x322   : > { %v1115_v34 = vcombine.low %v1090_v22, %v1098_v23 }
 0x323   : > { %v1123_v29 = vcombine.low %v1106_v15, %v1114_v20 }
 0x324   : > { %v1122_v41 = vrot.slane %v1115_v34, %v3314_v48 }
 0x325   : > { %v1130_v38 = vrot.slane %v1123_v29, %v3314_v48 }
 0x327   : > { %v1131_v42 = vcombine.low %v1122_v41, %v1130_v38  ;;  %v1132_v43 = vcombine.high %v1122_v41, %v1130_v38 }
 0x329   : > { %v1133_v44 = vpack.c.bf16 %v1131_v42, %v1131_v42  ;;  %v1134_v45 = vpack.c.bf16 %v1132_v43, %v1132_v43 }
 0x389   : > { %v1138_v51 = vpop.permute.xlu1 %1137 }
 0x38a   : > { %v1156_v53 = vcombine.high %v1138_v51, %v2921_v19  ;;  %v1163_v54 = vrot.slane %v1138_v51, %v3304_v36  ;;  %v1390_v51 = vrot.slane %v1385_v50, %v1389_v47 }
 0x38c   : > { %v1170_v58 = vrot.slane %v1156_v53, %v3304_v36  ;;  %v1171_v59 = vcombine.low %v1148_v52, %v1163_v54  ;;  %v1172_v60 = vcombine.high %v1148_v52, %v1163_v54 }
 0x38e   : > { %v1179_v63 = vrot.slane %v1171_v59, %v3314_v48  ;;  %v1186_v0 = vrot.slane %v1172_v60, %v3314_v48  ;;  %v1187_v1 = vcombine.low %v1155_v57, %v1170_v58  ;;  %v1188_v2 = vcombine.high %v1155_v57, %v1170_v58 }
 0x390   : > { %v1195_v5 = vrot.slane %v1187_v1, %v3314_v48  ;;  %v1202_v6 = vrot.slane %v1188_v2, %v3314_v48  ;;  %v1207_v7 = vcombine.low %v1179_v63, %v1186_v0  ;;  %v2470_v8 = vcombine.high %v1179_v63, %v1186_v0 }
 0x392   : > { %v1223_v11 = vcombine.low %v1195_v5, %v1202_v6  ;;  %v2471_v12 = vcombine.high %v1195_v5, %v1202_v6  ;;  %v1214_v13 = vrot.slane %v1207_v7, %v3304_v36  ;;  %v1222_v14 = vrot.slane %v2470_v8, %v3304_v36 }
 0x394   : > { %v1230_v16 = vrot.slane %v1223_v11, %v3304_v36  ;;  %v1238_v17 = vrot.slane %v2471_v12, %v3304_v36  ;;  %v1239_v18 = vcombine.low %v1214_v13, %v1222_v14 }
 0x396   : > { %v1247_v25 = vcombine.low %v1230_v16, %v1238_v17  ;;  %v1246_v26 = vrot.slane %v1239_v18, %v3314_v48 }
 0x398   : > { %v1254_v27 = vrot.slane %v1247_v25, %v3314_v48 }
 0x39a   : > { %v1255_v30 = vcombine.low %v1246_v26, %v1254_v27  ;;  %v1256_v32 = vcombine.high %v1246_v26, %v1254_v27 }
 0x39c   : > { %v1257_v35 = vpack.c.bf16 %v1255_v30, %v1255_v30  ;;  %v1258_v37 = vpack.c.bf16 %v1256_v32, %v1256_v32 }
 0x39e   : > { %v1397_v39 = vsel %vm1392_vm4, %v1257_v35, 0  ;;  %v1443_v40 = vsel %vm1392_vm4, %v1258_v37, 0 }
 0x39f   : > { %2547 = vmatpush3.bf16.xpose.msra.mxu1 %v1397_v39  ;;  %2553 = vmatpush3.bf16.xpose.msra.mxu0 %v1443_v40 }
 0x3a0   : > { %2558 = vmatprep.subr.bf16.mxu1 %v2921_v19  ;;  %2564 = vmatprep.subr.bf16.mxu0 %v2921_v19 }
 0x3a6   : > { %2549 = vmatmul.mubr.msk.bf16.vlgmr.msra.gmra.mrb[0].mxu1 %vm1392_vm4, %v1133_v44  ;;  %2555 = vmatmul.mubr.msk.bf16.vlgmr.msra.gmra.mrb[4].mxu0 %vm1392_vm4, %v1134_v45 }
 0x3a7   : > { %2560 = vmatprep.mubr.msk.bf16.mxu1 %vm2922_vm2, %v2921_v19  ;;  %2566 = vmatprep.mubr.msk.bf16.mxu0 %vm2922_vm2, %v2921_v19 }
 0x479   : > { %v1433_v52 = vpop.f32.mrb[0].mxu1  ;;  %v1479_v53 = vpop.f32.mrb[4].mxu0 }
 0x47a   : > { %v1434_v54 = vadd.f32 %v1433_v52, %v1390_v51  ;;  %v1480_v55 = vadd.f32 %v1479_v53, %v1390_v51  ;;  %v2550_v56 = vpop.f32.mrb[1].mxu1  ;;  %v2556_v57 = vpop.f32.mrb[5].mxu0 }
 0x47b   : > { %v1436_v58 = vpop.f32.mrb[2].mxu1  ;;  %v1482_v59 = vpop.f32.mrb[6].mxu0  ;;  %v2722_v57 = vld [vmem:[%s3225_s5] sm:$0xff]  }
 0x47c   : > { %v2551_v60 = vpop.f32.mrb[3].mxu1  ;;  %v2557_v61 = vpop.f32.mrb[7].mxu0  ;;  %v1486_v62 = vsel %vm1485_vm6, %v1434_v54, -inf  ;;  %v1489_v63 = vsel %vm1485_vm6, %v1480_v55, -inf }
 0x47d   : > { %1487 = vmax.xlane.f32.xlu1 %v1486_v62  ;;  %1490 = vmax.xlane.f32.xlu0 %v1489_v63 }
 0x50a   : > { %v1488_v33 = vpop.xlane.xlu1 %1487  ;;  %v1491_v0 = vpop.xlane.xlu0 %1490 }
 0x50b   : > { %v1492_v1 = vsub.f32 %v1434_v54, %v1488_v33  ;;  %v1493_v2 = vsub.f32 %v1480_v55, %v1491_v0 }
 0x50d   : > { %v1494_v3 = vmul.f32 1.442695, %v1492_v1  ;;  %v1496_v4 = vmul.f32 1.442695, %v1493_v2 }
 0x50f   : > { %2730 = vpow2.f32 %v1494_v3 }
 0x510   : > { %2732 = vpow2.f32 %v1496_v4 }
 0x519   : > { %v2731_v5 = vpop.eup %2730 }
 0x51a   : > { %v2733_v6 = vpop.eup %2732  ;;  %v1498_v7 = vsel %vm1485_vm6, %v2731_v5, 0.0 }
 0x51b   : > { %1499 = vadd.xlane.f32.xlu0 %v1498_v7  ;;  %v1501_v8 = vsel %vm1485_vm6, %v2733_v6, 0.0 }
 0x51c   : > { %1502 = vadd.xlane.f32.xlu1 %v1501_v8 }
 0x52d   : > { %1261 = vrot.lane.b32.xlu1 %v3293_v28, %s2928_s21 }
 0x531   : > { %1259 = vrot.lane.b32.xlu0 %v3289_v24, %s2928_s21 }
 0x5a8   : > { %v1500_v9 = vpop.xlane.xlu0 %1499 }
 0x5a9   : > { %v1503_v10 = vpop.xlane.xlu1 %1502  ;;  %2734 = vrcp.f32 %v1500_v9 }
 0x5aa   : > { %2736 = vrcp.f32 %v1503_v10 }
 0x5ac   : > { %v1260_v11 = vpop.permute.xlu0 %1259 }
 0x5ad   : > { %v1262_v12 = vpop.permute.xlu1 %1261  ;;  %v1265_v13 = vcombine.high %v1260_v11, %v2921_v19  ;;  %v1272_v14 = vrot.slane %v1260_v11, %v3304_v36 }
 0x5ae   : > { %v1280_v15 = vcombine.high %v1262_v12, %v2921_v19  ;;  %v1287_v16 = vrot.slane %v1262_v12, %v3304_v36 }
 0x5af   : > { %v1279_v17 = vrot.slane %v1265_v13, %v3304_v36  ;;  %v2723_v13 = vld [vmem:[%s3225_s5 + $0x8] sm:$0xff]   ;;  %s2929_s5 = smov 16  }
 0x5b0   : > { %v1294_v18 = vrot.slane %v1280_v15, %v3304_v36  ;;  %v1295_v20 = vcombine.low %v1272_v14, %v1287_v16  ;;  %v1296_v28 = vcombine.high %v1272_v14, %v1287_v16 }
 0x5b2   : > { %v1303_v24 = vrot.slane %v1295_v20, %v3314_v48  ;;  %v1310_v22 = vrot.slane %v1296_v28, %v3314_v48  ;;  %v1311_v23 = vcombine.low %v1279_v17, %v1294_v18  ;;  %v1312_v25 = vcombine.high %v1279_v17, %v1294_v18 }
 0x5b3   : > { %v2735_v42 = vpop.eup %2734 }
 0x5b4   : > { %v1319_v26 = vrot.slane %v1311_v23, %v3314_v48  ;;  %v1326_v27 = vrot.slane %v1312_v25, %v3314_v48  ;;  %v1331_v29 = vcombine.low %v1303_v24, %v1310_v22  ;;  %v2472_v30 = vcombine.high %v1303_v24, %v1310_v22  ;;  %v2737_v45 = vpop.eup %2736 }
 0x5b5   : > { %v1507_v49 = vmul.f32 %v2737_v45, %v2733_v6  ;;  %v1505_v50 = vmul.f32 %v2735_v42, %v2731_v5 }
 0x5b6   : > { %v1338_v32 = vrot.slane %v1331_v29, %v3304_v36  ;;  %v1347_v34 = vcombine.low %v1319_v26, %v1326_v27  ;;  %v2473_v35 = vcombine.high %v1319_v26, %v1326_v27  ;;  %v1346_v37 = vrot.slane %v2472_v30, %v3304_v36 }
 0x5b7   : > { %v1508_v55 = vpack.c.bf16 %v1505_v50, %v1505_v50  ;;  %v1509_v56 = vpack.c.bf16 %v1507_v49, %v1507_v49 }
 0x5b8   : > { %v1354_v38 = vrot.slane %v1347_v34, %v3304_v36  ;;  %v1362_v39 = vrot.slane %v2473_v35, %v3304_v36  ;;  %v1363_v40 = vcombine.low %v1338_v32, %v1346_v37 }
 0x5ba   : > { %v1371_v41 = vcombine.low %v1354_v38, %v1362_v39  ;;  %v1370_v43 = vrot.slane %v1363_v40, %v3314_v48 }
 0x5bc   : > { %v1378_v44 = vrot.slane %v1371_v41, %v3314_v48 }
 0x5be   : > { %v1379_v46 = vcombine.low %v1370_v43, %v1378_v44  ;;  %v1380_v47 = vcombine.high %v1370_v43, %v1378_v44 }
 0x5c0   : > { %v1381_v51 = vpack.c.bf16 %v1379_v46, %v1379_v46  ;;  %v1382_v52 = vpack.c.bf16 %v1380_v47, %v1380_v47 }
 0x5c2   : > { %v1515_v53 = vsel %vm1513_vm7, %v1381_v51, 0  ;;  %v1561_v54 = vsel %vm1513_vm7, %v1382_v52, 0  ;;  %v2725_v51 = vld [vmem:[%s3242_s6 + $0x8] sm:$0xff]  }
 0x5c3   : > { %2559 = vmatpush3.bf16.msra.mxu1 %v1515_v53  ;;  %2565 = vmatpush3.bf16.msra.mxu0 %v1561_v54 }
 0x5c4   : > { %2570 = vmatprep.subr.bf16.mxu1 %v2921_v19  ;;  %2578 = vmatprep.subr.bf16.mxu0 %v2921_v19 }
 0x5c6   : > { %2561 = vmatmul.mubr.msk.bf16.vlgmr.msra.gmra.mrb[4].mxu1 %vm1485_vm6, %v1508_v55  ;;  %2567 = vmatmul.mubr.msk.bf16.vlgmr.msra.gmra.mrb[8].mxu0 %vm1485_vm6, %v1509_v56  ;;  %v2484_v56 = vld [vmem:[%s3650_s12] ss:$0 sm:$0xff] }
 0x5c7   : > { %2574 = vmatprep.mubr.msk.bf16.mxu1 %vm2922_vm2, %v2921_v19  ;;  %2582 = vmatprep.mubr.msk.bf16.mxu0 %vm2922_vm2, %v2921_v19 }
 0x5c8   : > { %2571 = vmatpush3.bf16.msra.mxu1 %v2722_v57 }
 0x5c9   : > { %2572 = vmatprep.subr.bf16.mxu1 %v2921_v19 }
 0x5cc   : > { %2573 = vmatpush3.bf16.msra.mxu1 %v2723_v13 }
 0x5cd   : > { %2586 = vmatprep.subr.bf16.mxu1 %v2921_v19 }
 0x699   : > { %v1551_v58 = vpop.f32.mrb[4].mxu1  ;;  %v1597_v59 = vpop.f32.mrb[8].mxu0 }
 0x69a   : > { %v1603_v60 = vcombine.high %v1551_v58, %v2921_v19  ;;  %v1610_v61 = vrot.slane %v1551_v58, %v3304_v36  ;;  %v1618_v62 = vcombine.high %v1597_v59, %v2921_v19  ;;  %v1625_v63 = vrot.slane %v1597_v59, %v3304_v36  ;;  %v2562_v33 = vpop.f32.mrb[5].mxu1  ;;  %v2568_v0 = vpop.f32.mrb[9].mxu0 }
 0x69b   : > { %v1554_v1 = vpop.f32.mrb[6].mxu1  ;;  %v1600_v2 = vpop.f32.mrb[10].mxu0  ;;  %v2728_v33 = vld [vmem:[%s3252_s24 + $0x10] sm:$0xff]   ;;  %v2729_v0 = vld [vmem:[%s3252_s24 + $0x18] sm:$0xff]  }
 0x69c   : > { %v1617_v3 = vrot.slane %v1603_v60, %v3304_v36  ;;  %v1632_v4 = vrot.slane %v1618_v62, %v3304_v36  ;;  %v1633_v5 = vcombine.low %v1610_v61, %v1625_v63  ;;  %v1634_v6 = vcombine.high %v1610_v61, %v1625_v63  ;;  %v2563_v7 = vpop.f32.mrb[7].mxu1  ;;  %v2569_v8 = vpop.f32.mrb[11].mxu0  ;;  %v2726_v62 = vld [vmem:[%s3252_s24] sm:$0xff]   ;;  %v2727_v63 = vld [vmem:[%s3252_s24 + $0x8] sm:$0xff]  }
 0x69d   : > { %v2486_v1 = vld [vmem:[%s888_s8] ss:$0 sm:$0xff] }
 0x69e   : > { %v1641_v9 = vrot.slane %v1633_v5, %v3314_v48  ;;  %v1648_v10 = vrot.slane %v1634_v6, %v3314_v48  ;;  %v1649_v11 = vcombine.low %v1617_v3, %v1632_v4  ;;  %v1650_v12 = vcombine.high %v1617_v3, %v1632_v4 }
 0x6a0   : > { %v1657_v14 = vrot.slane %v1649_v11, %v3314_v48  ;;  %v1664_v15 = vrot.slane %v1650_v12, %v3314_v48  ;;  %v1669_v16 = vcombine.low %v1641_v9, %v1648_v10  ;;  %v2478_v17 = vcombine.high %v1641_v9, %v1648_v10 }
 0x6a2   : > { %v1676_v18 = vrot.slane %v1669_v16, %v3304_v36  ;;  %v1684_v20 = vrot.slane %v2478_v17, %v3304_v36  ;;  %v1685_v28 = vcombine.low %v1657_v14, %v1664_v15  ;;  %v2479_v24 = vcombine.high %v1657_v14, %v1664_v15  ;;  %v2490_v16 = vld [vmem:[%s896_s26] ss:$0 sm:$0xff] }
 0x6a4   : > { %v1692_v22 = vrot.slane %v1685_v28, %v3304_v36  ;;  %v1700_v23 = vrot.slane %v2479_v24, %v3304_v36  ;;  %v1701_v25 = vcombine.low %v1676_v18, %v1684_v20  ;;  %v2480_v36 = vld [vmem:[%s3649_s27] ss:$0 sm:$0xff] }
 0x6a6   : > { %v1709_v26 = vcombine.low %v1692_v22, %v1700_v23  ;;  %v1708_v27 = vrot.slane %v1701_v25, %v3314_v48 }
 0x6a8   : > { %v1716_v29 = vrot.slane %v1709_v26, %v3314_v48  ;;  %v945_v48 = vunpack.c.l.bf16 %v3277_v21  ;;  %v2724_v21 = vld [vmem:[%s3242_s6] sm:$0xff]   ;;  %s3651_s6 = sld [smem:[#allocation35_spill]] }
 0x6a9   : > { %2579 = vmatpush3.bf16.msra.mxu0 %v2724_v21 }
 0x6aa   : > { %v1718_v30 = vcombine.high %v1708_v27, %v1716_v29  ;;  %v1717_v32 = vcombine.low %v1708_v27, %v1716_v29  ;;  %2580 = vmatprep.subr.bf16.mxu0 %v2921_v19 }
 0x6ac   : > { %1720 = vrot.lane.b32.xlu1 %v1718_v30, %s2929_s5 }
 0x6ad   : > { %2581 = vmatpush3.bf16.msra.mxu0 %v2725_v51 }
 0x6ae   : > { %s3652_s1 = scalar_lea.vmem %s3651_s6, %s3191_s19  ;;  %s2933_s6 = smov (!%p2498_p10), 127  }
 0x6af   : > { %v2485_v58 = vld [vmem:[%s3652_s1] ss:$0 sm:$0xff]  ;;  %s2934_s1 = smov (!%p2498_p10), 1  }
 0x71e   : > { %v1721_v34 = vpop.permute.xlu1 %1720 }
 0x71f   : > { %v1723_v35 = vsel %vm1392_vm4, %v1717_v32, %v1721_v34 }
 0x720   : > { %v1724_v37 = vpack.c.bf16 %v1723_v35, %v1723_v35 }
 0x722   : > { %2575 = vmatmul.mubr.msk.bf16.vlgmr.msra.gmra.mrb[8].mxu1 %vm969_vm3, %v1724_v37 }
 0x723   : > { %2594 = vmatprep.mubr.msk.bf16.mxu1 %vm2922_vm2, %v2921_v19  ;;  %2587 = vmatpush3.bf16.msra.mxu1 %v2726_v62 }
 0x724   : > { %2588 = vmatprep.subr.bf16.mxu1 %v2921_v19 }
 0x727   : > { %2589 = vmatpush3.bf16.msra.mxu1 %v2727_v63 }
 0x728   : > { %2590 = vmatprep.subr.bf16.mxu1 %v2921_v19 }
 0x72b   : > { %2591 = vmatpush3.bf16.msra.mxu1 %v2728_v33 }
 0x72c   : > { %2592 = vmatprep.subr.bf16.mxu1 %v2921_v19 }
 0x72f   : > { %2593 = vmatpush3.bf16.msra.mxu1 %v2729_v0 }
 0x7f5   : > { %v1785_v38 = vpop.f32.mrb[8].mxu1 }
 0x7f6   : > { %v1786_v39 = vadd.f32 %v2480_v36, %v1785_v38  ;;  %v2576_v40 = vpop.f32.mrb[9].mxu1  ;;  %v2496_v36 = vld [vmem:[%s899_s28] ss:$0 sm:$0xff] }
 0x7f7   : > { %v1788_v41 = vpop.f32.mrb[10].mxu1  ;;  %v2497_v38 = vld [vmem:[%s902_s11] ss:$0 sm:$0xff]  ;;  %s3657_s11 = sld [smem:[#allocation26_spill]] (!%p2498_p10) }
 0x7f8   : > { %v2577_v42 = vpop.f32.mrb[11].mxu1  ;;  %v1791_v43 = vadd.f32 %v1786_v39, %v945_v48 }
 0x7f9   : > { %v2751_v42 = vld [vmem:[%s3656_s20] sm:$0xff] (!%p2498_p10)  }
 0x7fa   : > { %v1794_v44 = vsel %vm969_vm3, %v1791_v43, 0.0 }
 0x7fb   : > { %1795 = vadd.xlane.f32.xlu0 %v1794_v44  ;;  %v2752_v44 = vld [vmem:[%s3656_s20 + $0x8] sm:$0xff] (!%p2498_p10)  }
 0x888   : > { %v1796_v45 = vpop.xlane.xlu0 %1795 }
 0x889   : > { %v1798_v46 = vmul.f32 0.03125, %v1796_v45 }
 0x88b   : > { %v1799_v47 = vsub.f32 %v1791_v43, %v1798_v46  ;;  %v2930_v43 = vmov (!%p2498_p10), 0.0   ;;  %v2499_v46 = vld [vmem:[%s3658_s16] ss:$0 sm:$0xff] (!%p2498_p10) }
 0x88c   : > { %2598 = vmatprep.subr.bf16.mxu0 (!%p2498_p10), %v2930_v43 }
 0x88d   : > { %v1800_v49 = vmul.f32 %v1799_v47, %v1799_v47 }
 0x88f   : > { %v1801_v50 = vsel %vm969_vm3, %v1800_v49, 0.0 }
 0x890   : > { %1802 = vadd.xlane.f32.xlu1 %v1801_v50 }
 0x91d   : > { %v1803_v52 = vpop.xlane.xlu1 %1802 }
 0x91e   : > { %v1804_v53 = vmul.f32 0.03125, %v1803_v52 }
 0x920   : > { %v1805_v54 = vadd.f32 1e-12, %v1804_v53  ;;  %v2086_v53 = vld [vmem:[%s3657_s11] sm:$0xff] (!%p2498_p10) }
 0x921   : > { %vm2110_vm11 = vcmp.eq.s32.totalorder (!%p2498_p10), %v2086_v53, 1 }
 0x922   : > { %2738 = vrsqrt.f32 %v1805_v54 }
 0x92c   : > { %v2739_v55 = vpop.eup %2738 }
 0x92d   : > { %v1807_v57 = vmul.f32 %v2739_v55, %v1799_v47 }
 0x92f   : > { %v1814_v59 = vmul.f32 %v2484_v56, %v1807_v57 }
 0x931   : > { %v1821_v60 = vadd.f32 %v2485_v58, %v1814_v59 }
 0x933   : > { %v1822_v61 = vpack.c.bf16 %v1821_v60, %v1821_v60 }
 0x935   : > { %2583 = vmatmul.mubr.msk.bf16.vlgmr.msra.gmra.mrb[12].mxu0 %vm969_vm3, %v1822_v61 }
 0x936   : > { %2599 = vmatpush3.bf16.msra.mxu0 (!%p2498_p10), %v2751_v42  ;;  %2602 = vmatprep.mubr.msk.bf16.mxu0 (!%p2498_p10), %vm2931_vm10, %v2930_v43 }
 0x937   : > { %2600 = vmatprep.subr.bf16.mxu0 (!%p2498_p10), %v2930_v43 }
 0x93a   : > { %2601 = vmatpush3.bf16.msra.mxu0 (!%p2498_p10), %v2752_v44 }
 0xa08   : > { %v1883_v2 = vpop.f32.mrb[12].mxu0 }
 0xa09   : > { %v1884_v3 = vadd.f32 %v2486_v1, %v1883_v2  ;;  %v2584_v4 = vpop.f32.mrb[13].mxu0 }
 0xa0a   : > { %v1886_v5 = vpop.f32.mrb[14].mxu0 }
 0xa0b   : > { %v1889_v6 = vmul.f32 %v1884_v3, %v1884_v3  ;;  %v2585_v7 = vpop.f32.mrb[15].mxu0 }
 0xa0d   : > { %v1890_v8 = vmul.f32 %v1889_v6, %v1884_v3 }
 0xa0f   : > { %v1891_v9 = vmul.f32 0.044715, %v1890_v8 }
 0xa11   : > { %v1892_v10 = vadd.f32 %v1891_v9, %v1884_v3  ;;  %v2936_v9 = vmov (!%p2498_p10), 0  }
 0xa12   : > { %2744 = vset.pattern.permute.xlu1 (!%p2498_p10), %v2936_v9  ;;  %2750 = vset.pattern.permute.xlu0 (!%p2498_p10), %v2936_v9 }
 0xa13   : > { %v1893_v11 = vmul.f32 0.7978846, %v1892_v10 }
 0xa15   : > { %2740 = vtanh.f32 %v1893_v11 }
 0xa1f   : > { %v2741_v19 = vpop.eup %2740 }
 0xa20   : > { %v1895_v12 = vadd.f32 1.0, %v2741_v19  ;;  %v2148_v19 = vld [vmem:[%s3659_s17] sm:$0xff] (!%p2498_p10) }
 0xa21   : > { %vm2149_vm13 = vcmp.eq.s32.totalorder (!%p2498_p10), %v2148_v19, 3 }
 0xa22   : > { %v1896_v13 = vmul.f32 0.5, %v1895_v12 }
 0xa24   : > { %v1897_v14 = vmul.f32 %v1896_v13, %v1884_v3 }
 0xa26   : > { %v1898_v15 = vpack.c.bf16 %v1897_v14, %v1897_v14 }
 0xa28   : > { %2595 = vmatmul.mubr.msk.bf16.vlgmr.msra.gmra.mrb[12].mxu1 %vm1938_vm8, %v1898_v15 }
 0xafb   : > { %v1976_v17 = vpop.f32.mrb[12].mxu1 }
 0xafc   : > { %v1977_v18 = vadd.f32 %v2490_v16, %v1976_v17  ;;  %v2596_v20 = vpop.f32.mrb[13].mxu1 }
 0xafd   : > { %v1979_v28 = vpop.f32.mrb[14].mxu1 }
 0xafe   : > { %v2597_v24 = vpop.f32.mrb[15].mxu1  ;;  %v1982_v22 = vadd.f32 %v1977_v18, %v1821_v60 }
 0xb00   : > { %v1985_v23 = vsel %vm969_vm3, %v1982_v22, 0.0 }
 0xb01   : > { %1986 = vadd.xlane.f32.xlu0 %v1985_v23 }
 0xb8e   : > { %v1987_v25 = vpop.xlane.xlu0 %1986 }
 0xb8f   : > { %v1988_v26 = vmul.f32 0.03125, %v1987_v25 }
 0xb91   : > { %v1989_v27 = vsub.f32 %v1982_v22, %v1988_v26 }
 0xb93   : > { %v1990_v29 = vmul.f32 %v1989_v27, %v1989_v27 }
 0xb95   : > { %v1991_v30 = vsel %vm969_vm3, %v1990_v29, 0.0 }
 0xb96   : > { %1992 = vadd.xlane.f32.xlu0 %v1991_v30 }
 0xc23   : > { %v1993_v32 = vpop.xlane.xlu0 %1992 }
 0xc24   : > { %v1994_v34 = vmul.f32 0.03125, %v1993_v32 }
 0xc26   : > { %v1995_v35 = vadd.f32 1e-12, %v1994_v34 }
 0xc28   : > { %2742 = vrsqrt.f32 %v1995_v35 }
 0xc32   : > { %v2743_v37 = vpop.eup %2742 }
 0xc33   : > { %v1997_v48 = vmul.f32 %v2743_v37, %v1989_v27  ;;  %v2162_v37 = vand.u32 (!%p2498_p10), 127, %v1021_v31 }
 0xc35   : > { %v2004_v39 = vmul.f32 %v2496_v36, %v1997_v48  ;;  %2018 = sbr.rel (%p2498_p10) target bundleno = 4059 (0xfdb), region = 116  ;;  %vm2163_vm0 = vcmp.eq.s32.totalorder (!%p2498_p10), %v2162_v37, 4  ;;  %vm2170_vm1 = vcmp.eq.s32.totalorder (!%p2498_p10), %v2162_v37, 5  ;;  %vm2177_vm2 = vcmp.eq.s32.totalorder (!%p2498_p10), %v2162_v37, 6 }
 0xc37   : > { %v2011_v40 = vadd.f32 %v2497_v38, %v2004_v39 }
 0xc39   : > { %v2012_v41 = vpack.c.bf16 %v2011_v40, %v2011_v40 }
 0xc3b   : > { %2014 = vst.msk [vmem:[#allocation2] sm:$0xf] %vm2013_vm9, %v2012_v41 }
 0xc42   : > { %v2019_v45 = vld [vmem:[#allocation2] sm:$0xf] }
 0xc43   : > { %2603 = vmatmul.mubr.msk.bf16.vlgmr.msra.gmra.mrb[0].mxu0 %vm969_vm3, %v2019_v45 }
 0xd16   : > { %v2080_v47 = vpop.f32.mrb[0].mxu0 }
 0xd17   : > { %v3476_v49 = vadd.f32 %v2499_v46, %v2080_v47  ;;  %v2604_v50 = vpop.f32.mrb[1].mxu0 }
 0xd18   : > { %v2083_v21 = vpop.f32.mrb[2].mxu0 }
 0xd19   : > { %2124 = vrot.lane.b32.xlu1 %v3476_v49, %s2932_s23  ;;  %2088 = vrot.lane.b32.xlu0 %v3476_v49, %s2933_s6  ;;  %v2605_v51 = vpop.f32.mrb[3].mxu0 }
 0xd8b   : > { %v2089_v52 = vpop.permute.xlu0 %2088  ;;  %v2125_v55 = vpop.permute.xlu1 %2124 }
 0xd8c   : > { %v2091_v54 = vmax.f32 %v3476_v49, %v2089_v52  ;;  %v2127_v56 = vsel %vm2110_vm11, %v2125_v55, %v2089_v52  ;;  %v2111_v5 = vsel %vm2110_vm11, %v2089_v52, %v3476_v49  ;;  %v2150_v14 = vsel %vm2149_vm13, %v2089_v52, -3.4028235e+38 }
 0xd8d   : > { %vm2151_vm14 = vcmp.gt.f32.partialorder %v2150_v14, %v3476_v49 }
 0xd8e   : > { %2096 = vrot.lane.b32.xlu0 %v2091_v54, %s2934_s1  ;;  %v2092_v61 = vsub.f32 %v3476_v49, %v2091_v54  ;;  %v2503_v20 = vsel %vm2151_vm14, 1.0, %v2930_v43 }
 0xd90   : > { %v2093_v62 = vmul.f32 1.442695, %v2092_v61 }
 0xd92   : > { %2129 = vrot.lane.b32.xlu0 %v2127_v56, %s2934_s1 }
 0xe00   : > { %v2097_v57 = vpop.permute.xlu0 %2096 }
 0xe01   : > { %v2099_v58 = vsub.f32 %v3476_v49, %v2097_v57 }
 0xe03   : > { %v2100_v59 = vmul.f32 1.442695, %v2099_v58 }
 0xe04   : > { %v2130_v4 = vpop.permute.xlu0 %2129 }
 0xe05   : > { %2753 = vpow2.f32 %v2100_v59 }
 0xe06   : > { %2755 = vpow2.f32 %v2093_v62 }
 0xe0f   : > { %v2754_v60 = vpop.eup %2753 }
 0xe10   : > { %2103 = vrot.lane.b32.xlu1 %v2754_v60, %s2933_s6  ;;  %v2756_v63 = vpop.eup %2755 }
 0xe82   : > { %v2104_v33 = vpop.permute.xlu1 %2103 }
 0xe83   : > { %v2106_v0 = vadd.f32 %v2756_v63, %v2104_v33 }
 0xe85   : > { %2757 = vlog2.f32 %v2106_v0 }
 0xe8f   : > { %v2758_v1 = vpop.eup %2757 }
 0xe90   : > { %v2108_v2 = vmul.f32 0.6931472, %v2758_v1 }
 0xe92   : > { %v2109_v3 = vadd.f32 %v2108_v2, %v2091_v54 }
 0xe94   : > { %v2132_v6 = vsub.f32 %v2109_v3, %v2130_v4  ;;  %v2112_v7 = vsub.f32 %v2109_v3, %v2111_v5 }
 0xe96   : > { %2134 = vrot.lane.b32.xlu1 %v2132_v6, %s2932_s23  ;;  %v2114_v8 = vsel %vm2113_vm12, %v2112_v7, 0.0 }
 0xe97   : > { %2115 = vadd.xlane.f32.xlu0 %v2114_v8 }
 0xead   : > { %2154 = vrot.lane.b32.xlu0 %v3476_v49, %s2935_s18 }
 0xf08   : > { %v2135_v10 = vpop.permute.xlu1 %2134 }
 0xf09   : > { %v2137_v11 = vsel %vm2113_vm12, %v2135_v10, 0.0 }
 0xf0a   : > { %2138 = vadd.xlane.f32.xlu1 %v2137_v11 }
 0xf24   : > { %v2116_v12 = vpop.xlane.xlu0 %2115 }
 0xf25   : > { %v2117_v13 = vrot.slane %v2116_v12, 4 }
 0xf27   : > { %v2118_v15 = vadd.f32 %v2117_v13, %v2116_v12 }
 0xf28   : > { %v2155_v16 = vpop.permute.xlu0 %2154 }
 0xf29   : > { %v2119_v17 = vrot.slane %v2118_v15, 2  ;;  %v2157_v18 = vsel %vm2149_vm13, %v2155_v16, -3.4028235e+38 }
 0xf2a   : > { %vm2158_vm15 = vcmp.gt.f32.partialorder %v2157_v18, %v2125_v55 }
 0xf2b   : > { %v2504_v28 = vsel %vm2158_vm15, 1.0, %v2930_v43  ;;  %v2120_v24 = vadd.f32 %v2119_v17, %v2118_v15 }
 0xf2c   : > { %v2745_v22 = vpack.i.bf16 %v2504_v28, %v2503_v20 }
 0xf2d   : > { %v2121_v23 = vrot.slane %v2120_v24, 1 }
 0xf2e   : > { %2746 = vperm.xlu1 %2744, %v2745_v22  }
 0xf2f   : > { %v2122_v25 = vadd.f32 %v2121_v23, %v2120_v24 }
 0xf31   : > { %2606 = vpush %v2122_v25 }
 0xf62   : > { %s2607_s8 = spop %2606 }
 0xf97   : > { %v2139_v26 = vpop.xlane.xlu1 %2138 }
 0xf98   : > { %v2140_v27 = vrot.slane %v2139_v26, 4 }
 0xf9a   : > { %v2141_v29 = vadd.f32 %v2140_v27, %v2139_v26 }
 0xf9c   : > { %v2142_v30 = vrot.slane %v2141_v29, 2 }
 0xf9e   : > { %v2143_v32 = vadd.f32 %v2142_v30, %v2141_v29 }
 0xfa0   : > { %v2144_v34 = vrot.slane %v2143_v32, 1 }
 0xfa2   : > { %v2145_v35 = vadd.f32 %v2144_v34, %v2143_v32 }
 0xfa4   : > { %2608 = vpush %v2145_v35 }
 0xfad   : > { %v2747_v36 = vpop.permute.xlu1 %2746 }
 0xfae   : > { %v2748_v48 = vunpack.i.l.bf16 %v2747_v36  ;;  %v2749_v38 = vunpack.i.h.bf16 %v2747_v36 }
 0xfb0   : > { %v2169_v39 = vsel %vm2163_vm0, %v2748_v48, %v3476_v49 }
 0xfb1   : > { %v2176_v40 = vsel %vm2170_vm1, %v2749_v38, %v2169_v39 }
 0xfd5   : > { %s2609_s24 = spop %2608 }
 0xfd6   : > { %s2147_s26 = sadd.f32 %s2609_s24, %s2607_s8 }
 0xfd8   : > { %v2178_v41 = vstv %s2147_s26 }
 0xfd9   : > { %v2179_v42 = vsel %vm2177_vm2, %v2178_v41, %v2176_v40 }
 0xfda   : > { %2180 = vst [vmem:[%s843_s0] sm:$0xff] %v2179_v42 }
 0xfdb PF: > { %s3660_s4 = sld [smem:[#allocation16_spill]]  ;;  %s3661_s22 = sld [smem:[#allocation13_spill]] }
 0xfdc   : > { %s3662_s2 = sld [smem:[#allocation21_spill]]  ;;  %s3663_s30 = sld [smem:[#allocation41_spill]] }
 0xfdd   : > { %s2195_s28 = sshll.u32 %s843_s0, 4  ;;  %s2937_s12 = smov [#allocation8]   ;;  %s2196_s28 = int_to_ptr.vmem [resolvable:$true] %s2195_s28 }
 0xfde   : > { %s2815_s19 = scalar_lea.vmem %s2196_s28, 128  ;;  %s2819_s16 = sshll.u32 %s2937_s12, 4  ;;  %s2820_s16 = int_to_ptr.vmem [resolvable:$false] %s2819_s16 }
 0xfdf   : > { %p2816_p13 = scmp.ne.s32.totalorder %s2196_s28, %s2815_s19  ;;  %s2821_s23 = scalar_lea.vmem %s2820_s16, 256 }
 0xfe0   : > { %p2822_p7 = scmp.lt.s32.totalorder %s2196_s28, %s2820_s16  ;;  %p2823_p8 = scmp.lt.s32.totalorder %s2821_s23, %s2815_s19 }
 0xfe1   : > { %s2506_s21 = sshll.u32 %s3660_s4, 7  ;;  %s3664_s25 = sand.u32 1, %s3661_s22  }
 0xfe2   : > { %s3502_s27 = scalar_lea.hbm %s3663_s30, %s2506_s21  ;;  %s2182_s11 = scalar_lea.sflag [#allocation5], %s3664_s25 }
 0xfe3   : > { %p3665_p4 = scmp.ne.s32.totalorder %s3662_s2, 0  ;;  %p2824_p11 = por %p2823_p8, %p2822_p7 }
 0xfe5   : > { %p2817_p5 = pnand %p2816_p13, %p3665_p4 }
 0xfe7   : > { %p2818_p6 = pneg %p2817_p5 }
 0xfe9   : > { %p2825_p12 = pnand %p2824_p11, %p2818_p6 }
 0xfeb   : > { %2828 = shalt.err (!%p2825_p12)
}
 0xfec   : > { %s2829_s29 = scalar_lea.hbm %s3502_s27, 128  ;;  %s2833_s1 = scalar_lea.hbm %s3663_s30, 256 }
 0xfed   : > { %p2830_p1 = scmp.ne.s32.totalorder %s3502_s27, %s2829_s29  ;;  %p2834_p2 = scmp.lt.u32.totalorder %s3502_s27, %s3663_s30 }
 0xfee   : > { %p2835_p9 = scmp.lt.u32.totalorder %s2833_s1, %s2829_s29  ;;  %p2837_p13 = scmp.lt.u32.totalorder %s2829_s29, %s3502_s27 }
 0xfef   : > { %p2831_p3 = pnand %p2830_p1, %p3665_p4 }
 0xff0   : > { %p2836_p10 = por %p2835_p9, %p2834_p2 }
 0xff1   : > { %p2832_p0 = pneg %p2831_p3 }
 0xff2   : > { %p2838_p5 = por %p2837_p13, %p2836_p10 }
 0xff4   : > { %p2839_p6 = pnand %p2838_p5, %p2832_p0 }
 0xff6   : > { %2842 = shalt.err (!%p2839_p6)
}
 0xff7   : > { %2618 = dma.vmem_to_hbm [thread:$0]  (%p3665_p4), %s2196_s28, 128, %s3502_s27, %s2182_s11  }
 0xff8 PF: > { %s3666_s8 = sld [smem:[#allocation19_spill]]  ;;  %s3667_s24 = sld [smem:[#allocation12_spill]] }
 0xff9   : > { %s3668_s26 = sld [smem:[#allocation23_spill]] }
 0xffe   : > { %p2635_p7 = scmp.ge.s32.totalorder %s3666_s8, 2  ;;  %s2207_s4 = sand.u32 1, %s3667_s24  }
 0xfff   : > { %p3669_p8 = scmp.ne.s32.totalorder %s3668_s26, 0  ;;  %s2208_s22 = scalar_lea.sflag [#allocation5], %s2207_s4 }
0x1001   : > { %p2628_p11 = pnand %p2635_p7, %p3669_p8 }
0x1003   : > { %2884 = dma.done.wait (!%p2628_p11), %s2208_s22, 128  }
0x1004   : > { %2886 = vsyncadd (!%p2628_p11), %s2208_s22, 4294967168  ;;  %s35_s26 = sadd.s32 1, %s3666_s8   ;;  %s3670_s1 = sld [smem:[#allocation13_spill]] }
0x1005   : > { %p32_p12 = scmp.ge.s32.totalorder %s35_s26, 6   ;;  %s3671_s22 = sld [smem:[#allocation14_spill]] }
0x1006   : > { %s3672_s23 = sld [smem:[#allocation24_spill]]  ;;  %s3673_s24 = sld [smem:[#allocation17_spill]] }
0x1007   : > { %s3674_s2 = sld [smem:[#allocation18_spill]]  ;;  %s3675_s25 = sld [smem:[#allocation20_spill]] }
0x1008   : > { %s3676_s3 = sld [smem:[#allocation22_spill]]  ;;  %34 = sbr.rel (!%p32_p12) target bundleno = 23 (0x17), region = 197 }
0x100f   :  { %2213 = vsyncpa [#allocation4], 1 }
0x1010   :  { %2215 = vsyncpa [#allocation4 + $0x1], 1 }
0x1011   :  { %2216 = vsyncpa [#allocation7], 1 }
0x1012   :  { %2217 = vsyncpa [#allocation5], 1 }
0x1013   :  { %2219 = vsyncpa [#allocation5 + $0x1], 1 }

</bundles_post_ra>
